<compile_context>
chip_gen: v6e
topology: v6e:2x2x1
jax: 0.10.0
libtpu: 0.0.40
codegen_flags: <defaults>
</compile_context>

<pallas_src>
import functools
import random

import jax
import jax.numpy as jnp
from jax.experimental import pallas as pl
from jax.experimental.pallas import tpu as pltpu


# ------------------------------ helpers -------------------------------------


def _round_up(x, m):
    return (x + m - 1) // m * m


def _lstm_cell(xh, c, w, b, Hp):
    """xh:[B,Ep+Hp] c:[B,Hp] w:[Ep+Hp,4Hp] b:[1,4Hp] -> (h_new, c_new)."""
    gates = jnp.dot(xh, w, preferred_element_type=jnp.float32) + b
    i = jax.nn.sigmoid(gates[:, 0:Hp])
    f = jax.nn.sigmoid(gates[:, Hp:2 * Hp])
    g = jnp.tanh(gates[:, 2 * Hp:3 * Hp])
    o = jax.nn.sigmoid(gates[:, 3 * Hp:4 * Hp])
    c_new = f * c + i * g
    h_new = o * jnp.tanh(c_new)
    return h_new, c_new


# --------------------------- encoder kernel ----------------------------------


def _encoder_kernel(x_ref, w_ref, b_ref, h_out_ref, c_out_ref):
    """One fused encoder: grid over time, h/c carried in resident output blocks.

    x_ref:[1,Bp,Ep]  w_ref:[Ep+Hp,4Hp]  b_ref:[1,4Hp]  h/c out:[Bp,Hp].
    """
    Hp = h_out_ref.shape[-1]
    t = pl.program_id(0)

    @pl.when(t == 0)
    def _():
        h_out_ref[...] = jnp.zeros_like(h_out_ref)
        c_out_ref[...] = jnp.zeros_like(c_out_ref)

    x = x_ref[0]                                    # [Bp, Ep]
    h = h_out_ref[...]
    c = c_out_ref[...]
    xh = jnp.concatenate([x, h], axis=-1)           # single merged matmul input
    h_new, c_new = _lstm_cell(xh, c, w_ref[...], b_ref[...], Hp)
    h_out_ref[...] = h_new
    c_out_ref[...] = c_new


def encoder_forward(x_emb, w, b):
    """x_emb:[src_len,Bp,Ep] -> (h, c) each [Bp,Hp].  One pallas_call total."""
    src_len, Bp, Ep = x_emb.shape
    Hp = w.shape[1] // 4
    h, c = pl.pallas_call(
        _encoder_kernel,
        out_shape=(
            jax.ShapeDtypeStruct((Bp, Hp), jnp.float32),
            jax.ShapeDtypeStruct((Bp, Hp), jnp.float32),
        ),
        grid_spec=pltpu.PrefetchScalarGridSpec(
            num_scalar_prefetch=0,
            grid=(src_len,),
            in_specs=[
                pl.BlockSpec((1, Bp, Ep), lambda t: (t, 0, 0)),
                pl.BlockSpec((Ep + Hp, 4 * Hp), lambda t: (0, 0)),   # resident
                pl.BlockSpec((1, 4 * Hp), lambda t: (0, 0)),          # resident
            ],
            out_specs=(
                pl.BlockSpec((Bp, Hp), lambda t: (0, 0)),             # carry
                pl.BlockSpec((Bp, Hp), lambda t: (0, 0)),             # carry
            ),
        ),
        compiler_params=pltpu.CompilerParams(
            dimension_semantics=("arbitrary",)),
    )(x_emb, w, b)
    return h, c


# --------------------------- decoder kernel ----------------------------------


def _decoder_kernel(tf_ref, y_ref, h0_ref, c0_ref, w_ref, b_ref,
                    emb_ref, fcw_ref, fcb_ref, out_ref,
                    x_scr, h_scr, c_scr, *, out_vocab):
    """Fused decoder step for t = g+1 (g = grid index).

    tf_ref:[steps] int32 (SMEM, scalar prefetch)  y_ref:[tgt_len,Bp,Ep] (resident)
    h0/c0:[Bp,Hp]  w:[Ep+Hp,4Hp]  b:[1,4Hp]  emb:[Vp,Ep]  fcw:[Hp,Vp] fcb:[1,Vp]
    out_ref:[1,Bp,Vp]   scratch: x_scr:[Bp,Ep]  h_scr/c_scr:[Bp,Hp]
    """
    g = pl.program_id(0)
    Hp = h_scr.shape[-1]
    Bp, Vp = out_ref.shape[1], out_ref.shape[2]

    @pl.when(g == 0)
    def _():
        x_scr[...] = y_ref[0]          # embedding of batch_Y[0]
        h_scr[...] = h0_ref[...]
        c_scr[...] = c0_ref[...]

    x = x_scr[...]
    h = h_scr[...]
    c = c_scr[...]
    xh = jnp.concatenate([x, h], axis=-1)
    h_new, c_new = _lstm_cell(xh, c, w_ref[...], b_ref[...], Hp)
    h_scr[...] = h_new
    c_scr[...] = c_new

    # FC projection to (padded) vocab.
    logits = (jnp.dot(h_new, fcw_ref[...], preferred_element_type=jnp.float32)
              + fcb_ref[...])
    out_ref[0] = logits

    # Greedy top-1 over the *logical* vocab (first max index, like torch.max),
    # then its embedding via one-hot @ emb (MXU), all in-kernel.
    lane = jax.lax.broadcasted_iota(jnp.int32, (Bp, Vp), 1)
    masked = jnp.where(lane < out_vocab, logits, -1e30)
    m = jnp.max(masked, axis=1, keepdims=True)
    first_idx = jnp.min(jnp.where(masked == m, lane, Vp), axis=1, keepdims=True)
    onehot = (lane == first_idx).astype(jnp.float32)
    top1_emb = jnp.dot(onehot, emb_ref[...], preferred_element_type=jnp.float32)

    # Teacher-forcing select for the next step's input embedding.
    tf = tf_ref[g].astype(jnp.float32)             # scalar from SMEM
    x_scr[...] = tf * y_ref[g + 1] + (1.0 - tf) * top1_emb


def decoder_forward(tf_flags, y_emb, h0, c0, w, b, emb_p, fcw, fcb, *, out_vocab):
    """Returns logits for steps t=1..tgt_len-1: [tgt_len-1, Bp, Vp]."""
    tgt_len, Bp, Ep = y_emb.shape
    Hp = h0.shape[-1]
    Vp = fcw.shape[1]
    steps = tgt_len - 1
    kern = functools.partial(_decoder_kernel, out_vocab=out_vocab)
    return pl.pallas_call(
        kern,
        out_shape=jax.ShapeDtypeStruct((steps, Bp, Vp), jnp.float32),
        grid_spec=pltpu.PrefetchScalarGridSpec(
            num_scalar_prefetch=1,                 # tf_flags -> SMEM
            grid=(steps,),
            in_specs=[
                pl.BlockSpec((tgt_len, Bp, Ep), lambda g, tf: (0, 0, 0)),
                pl.BlockSpec((Bp, Hp), lambda g, tf: (0, 0)),
                pl.BlockSpec((Bp, Hp), lambda g, tf: (0, 0)),
                pl.BlockSpec((Ep + Hp, 4 * Hp), lambda g, tf: (0, 0)),
                pl.BlockSpec((1, 4 * Hp), lambda g, tf: (0, 0)),
                pl.BlockSpec((Vp, Ep), lambda g, tf: (0, 0)),
                pl.BlockSpec((Hp, Vp), lambda g, tf: (0, 0)),
                pl.BlockSpec((1, Vp), lambda g, tf: (0, 0)),
            ],
            out_specs=pl.BlockSpec((1, Bp, Vp), lambda g, tf: (g, 0, 0)),
            scratch_shapes=[
                pltpu.VMEM((Bp, Ep), jnp.float32),   # current input embedding
                pltpu.VMEM((Bp, Hp), jnp.float32),   # h carry
                pltpu.VMEM((Bp, Hp), jnp.float32),   # c carry
            ],
        ),
        compiler_params=pltpu.CompilerParams(
            dimension_semantics=("arbitrary",)),
    )(tf_flags, y_emb, h0, c0, w, b, emb_p, fcw, fcb)


# ------------------------------ parameters -----------------------------------


def init_params(key, *, in_vocab, out_vocab, emb, hidden):
    """Logical (PyTorch-layout, pre-transposed) parameters."""
    ks = jax.random.split(key, 8)
    s = 0.1

    def n(k, shape):
        return jax.random.normal(k, shape, dtype=jnp.float32) * s

    return {
        "enc_emb": n(ks[0], (in_vocab, emb)),
        "enc_w_ih": n(ks[1], (emb, 4 * hidden)),
        "enc_w_hh": n(ks[2], (hidden, 4 * hidden)),
        "enc_b": n(ks[3], (1, 4 * hidden)),            # b_ih + b_hh folded
        "dec_emb": n(ks[4], (out_vocab, emb)),
        "dec_w_ih": n(ks[5], (emb, 4 * hidden)),
        "dec_w_hh": n(ks[6], (hidden, 4 * hidden)),
        "dec_b": n(ks[7], (1, 4 * hidden)),
        "fc_w": n(jax.random.fold_in(key, 100), (hidden, out_vocab)),
        "fc_b": n(jax.random.fold_in(key, 101), (1, out_vocab)),
    }


def _pad2(a, shape):
    out = jnp.zeros(shape, a.dtype)
    return out.at[:a.shape[0], :a.shape[1]].set(a)


def _stack_lstm_weights(w_ih, w_hh, b, E, H, Ep, Hp):
    """Stack [[W_ih];[W_hh]] -> [Ep+Hp, 4*Hp] with each gate in its own 128-aligned block."""
    w = jnp.zeros((Ep + Hp, 4 * Hp), jnp.float32)
    bp = jnp.zeros((1, 4 * Hp), jnp.float32)
    for k in range(4):                              # gate order i, f, g, o
        w = w.at[:E, k * Hp:k * Hp + H].set(w_ih[:, k * H:(k + 1) * H])
        w = w.at[Ep:Ep + H, k * Hp:k * Hp + H].set(w_hh[:, k * H:(k + 1) * H])
        bp = bp.at[:, k * Hp:k * Hp + H].set(b[:, k * H:(k + 1) * H])
    return w, bp


def pad_params(p, *, emb, hidden, out_vocab):
    E, H, V = emb, hidden, out_vocab
    Ep, Hp, Vp = _round_up(E, 128), _round_up(H, 128), _round_up(V, 128)
    enc_w, enc_b = _stack_lstm_weights(p["enc_w_ih"], p["enc_w_hh"], p["enc_b"], E, H, Ep, Hp)
    dec_w, dec_b = _stack_lstm_weights(p["dec_w_ih"], p["dec_w_hh"], p["dec_b"], E, H, Ep, Hp)
    return {
        "enc_emb": _pad2(p["enc_emb"], (p["enc_emb"].shape[0], Ep)),
        "enc_w": enc_w, "enc_b": enc_b,
        "dec_emb": _pad2(p["dec_emb"], (Vp, Ep)),
        "dec_w": dec_w, "dec_b": dec_b,
        "fc_w": _pad2(p["fc_w"], (Hp, Vp)),
        "fc_b": _pad2(p["fc_b"], (1, Vp)),
    }


# ------------------------------ forward --------------------------------------


@functools.partial(jax.jit, static_argnames=("out_vocab",))
def _forward(pp, batch_X, batch_Y, tf_flags, *, out_vocab):
    src_len, B = batch_X.shape
    tgt_len = batch_Y.shape[0]
    Bp = max(8, _round_up(B, 8))

    bx = jnp.zeros((src_len, Bp), batch_X.dtype).at[:, :B].set(batch_X)
    by = jnp.zeros((tgt_len, Bp), batch_Y.dtype).at[:, :B].set(batch_Y)

    # Embedding gathers done once with XLA (token->row gather has no cheap
    # rectangular BlockSpec form); everything else lives in the two kernels.
    x_emb = jnp.take(pp["enc_emb"], bx, axis=0)     # [src_len, Bp, Ep]
    y_emb = jnp.take(pp["dec_emb"], by, axis=0)     # [tgt_len, Bp, Ep]

    h, c = encoder_forward(x_emb, pp["enc_w"], pp["enc_b"])
    logits_all = decoder_forward(tf_flags, y_emb, h, c,
                                 pp["dec_w"], pp["dec_b"],
                                 pp["dec_emb"], pp["fc_w"], pp["fc_b"],
                                 out_vocab=out_vocab)
    logits = logits_all[:, :B, :out_vocab]          # drop padding
    zeros0 = jnp.zeros((1, B, out_vocab), jnp.float32)
    return jnp.concatenate([zeros0, logits], axis=0)   # outputs[0] stays zero


def seq2seq_forward(padded_params, batch_X, batch_Y, *, out_vocab,
                    teacher_forcing_ratio=0.5, seed=0):
    """Mirrors Seq2Seq.forward: returns [tgt_len, B, vocab] (outputs[0] = zeros).

    The python-side `random.random()` coin flips are drawn on the host (like
    the reference module) and passed to the device as data, so they are NOT
    frozen into the jitted graph.
    """
    tgt_len = batch_Y.shape[0]
    rng = random.Random(seed)
    tf_flags = jnp.array(
        [1 if rng.random() < teacher_forcing_ratio else 0
         for _ in range(tgt_len - 1)], dtype=jnp.int32)
    return _forward(padded_params, batch_X, batch_Y, tf_flags, out_vocab=out_vocab)


# --------------------------- pure-JAX reference -------------------------------


def _reference_forward(params, batch_X, batch_Y, tf_flags, *, hidden, out_vocab):
    H = hidden
    src_len, B = batch_X.shape
    tgt_len = batch_Y.shape[0]

    def cell(x, h, c, w_ih, w_hh, b):
        gates = x @ w_ih + h @ w_hh + b
        i = jax.nn.sigmoid(gates[:, :H]); f = jax.nn.sigmoid(gates[:, H:2 * H])
        g = jnp.tanh(gates[:, 2 * H:3 * H]); o = jax.nn.sigmoid(gates[:, 3 * H:])
        c = f * c + i * g
        return o * jnp.tanh(c), c

    h = jnp.zeros((B, H), jnp.float32); c = jnp.zeros((B, H), jnp.float32)
    for t in range(src_len):
        x = params["enc_emb"][batch_X[t]]
        h, c = cell(x, h, c, params["enc_w_ih"], params["enc_w_hh"], params["enc_b"])
    outs = [jnp.zeros((B, out_vocab), jnp.float32)]
    inp = batch_Y[0]
    for t in range(1, tgt_len):
        x = params["dec_emb"][inp]
        h, c = cell(x, h, c, params["dec_w_ih"], params["dec_w_hh"], params["dec_b"])
        logits = h @ params["fc_w"] + params["fc_b"]
        outs.append(logits)
        top1 = jnp.argmax(logits, axis=1).astype(batch_Y.dtype)
        inp = jnp.where(tf_flags[t - 1] > 0, batch_Y[t], top1)
    return jnp.stack(outs, axis=0)


# --------------------------------- main ---------------------------------------


if __name__ == "__main__":
    IN_VOCAB = 64
    OUT_VOCAB = 64
    EMB = 16
    HIDDEN = 32
    SRC_LEN = 6
    TGT_LEN = 8
    BATCH = 2

    key = jax.random.PRNGKey(0)
    k_par, k_x, k_y = jax.random.split(key, 3)

    logical = init_params(k_par, in_vocab=IN_VOCAB, out_vocab=OUT_VOCAB,
                          emb=EMB, hidden=HIDDEN)
    pp = pad_params(logical, emb=EMB, hidden=HIDDEN, out_vocab=OUT_VOCAB)

    batch_X = jax.random.randint(k_x, (SRC_LEN, BATCH), 0, IN_VOCAB, dtype=jnp.int32)
    batch_Y = jax.random.randint(k_y, (TGT_LEN, BATCH), 0, OUT_VOCAB, dtype=jnp.int32)

    # Numerical check against a pure-JAX reference with full teacher forcing
    # (no argmax feedback, so small matmul rounding cannot cascade).
    out_tf = seq2seq_forward(pp, batch_X, batch_Y, out_vocab=OUT_VOCAB,
                             teacher_forcing_ratio=1.0, seed=0)
    out_tf = jax.block_until_ready(out_tf)
    ref_tf = _reference_forward(logical, batch_X, batch_Y,
                                jnp.ones((TGT_LEN - 1,), jnp.int32),
                                hidden=HIDDEN, out_vocab=OUT_VOCAB)
    assert out_tf.shape == (TGT_LEN, BATCH, OUT_VOCAB)
    assert bool(jnp.allclose(out_tf, ref_tf, atol=2e-2, rtol=2e-2))

    # Demo run matching the module's default (teacher_forcing_ratio=0.5):
    # exercises the in-kernel greedy argmax + teacher-forcing select path.
    outputs = seq2seq_forward(pp, batch_X, batch_Y, out_vocab=OUT_VOCAB,
                              teacher_forcing_ratio=0.5, seed=0)
    outputs = jax.block_until_ready(outputs)

    assert outputs.shape == (TGT_LEN, BATCH, OUT_VOCAB)
    assert bool(jnp.all(outputs[0] == 0.0))
    assert bool(jnp.all(jnp.isfinite(outputs)))
    print("KERNEL_OK")
</pallas_src>

<mosaic_0001>
module attributes {stable_mosaic.version = 11 : i64} {
  func.func @_encoder_kernel(%arg0: i32, %arg1: memref<1x8x128xf32, #tpu.memory_space<vmem>>, %arg2: memref<256x512xf32, #tpu.memory_space<vmem>>, %arg3: memref<1x512xf32, #tpu.memory_space<vmem>>, %arg4: memref<8x128xf32, #tpu.memory_space<vmem>>, %arg5: memref<8x128xf32, #tpu.memory_space<vmem>>) attributes {dimension_semantics = [#tpu.dimension_semantics<arbitrary>], iteration_bounds = array<i64: 6>, scalar_prefetch = 0 : i64, scratch_operands = 0 : i64, tpu.core_type = #tpu.core_type<tc>, window_params = [{transform_indices = @transform_0, window_bounds = array<i64: 1, 8, 128>}, {pipeline_mode = #tpu.pipeline_mode<synchronous>, transform_indices = @transform_1, window_bounds = array<i64: 256, 512>}, {pipeline_mode = #tpu.pipeline_mode<synchronous>, transform_indices = @transform_2, window_bounds = array<i64: 1, 512>}, {pipeline_mode = #tpu.pipeline_mode<synchronous>, transform_indices = @transform_3, window_bounds = array<i64: 8, 128>}, {pipeline_mode = #tpu.pipeline_mode<synchronous>, transform_indices = @transform_4, window_bounds = array<i64: 8, 128>}]} {
    %c0_i32 = arith.constant 0 : i32
    %0 = arith.cmpi eq, %arg0, %c0_i32 : i32
    %1 = arith.extui %0 : i1 to i32
    %c0_i32_0 = arith.constant 0 : i32
    %2 = arith.cmpi ne, %1, %c0_i32_0 : i32
    scf.if %2 {
      %cst_18 = arith.constant 0.000000e+00 : f32
      %40 = vector.broadcast %cst_18 : f32 to vector<8x128xf32>
      %c0_19 = arith.constant 0 : index
      %c0_20 = arith.constant 0 : index
      %41 = vector.load %arg4[%c0_19, %c0_20] : memref<8x128xf32, #tpu.memory_space<vmem>>, vector<8x128xf32>
      tpu.vector_store %arg4[%c0_19, %c0_20], %40 {strides = array<i32>} : memref<8x128xf32, #tpu.memory_space<vmem>>, vector<8x128xf32>,
      %cst_21 = arith.constant 0.000000e+00 : f32
      %42 = vector.broadcast %cst_21 : f32 to vector<8x128xf32>
      %c0_22 = arith.constant 0 : index
      %c0_23 = arith.constant 0 : index
      %43 = vector.load %arg5[%c0_22, %c0_23] : memref<8x128xf32, #tpu.memory_space<vmem>>, vector<8x128xf32>
      tpu.vector_store %arg5[%c0_22, %c0_23], %42 {strides = array<i32>} : memref<8x128xf32, #tpu.memory_space<vmem>>, vector<8x128xf32>,
    } else {
    }
    %c0 = arith.constant 0 : index
    %c0_1 = arith.constant 0 : index
    %c0_2 = arith.constant 0 : index
    %3 = vector.load %arg1[%c0, %c0_1, %c0_2] : memref<1x8x128xf32, #tpu.memory_space<vmem>>, vector<1x8x128xf32>
    %4 = vector.shape_cast %3 : vector<1x8x128xf32> to vector<8x128xf32>
    %c0_3 = arith.constant 0 : index
    %c0_4 = arith.constant 0 : index
    %5 = vector.load %arg4[%c0_3, %c0_4] : memref<8x128xf32, #tpu.memory_space<vmem>>, vector<8x128xf32>
    %c0_5 = arith.constant 0 : index
    %c0_6 = arith.constant 0 : index
    %6 = vector.load %arg5[%c0_5, %c0_6] : memref<8x128xf32, #tpu.memory_space<vmem>>, vector<8x128xf32>
    %7 = tpu.concatenate %4, %5 in 1 : vector<8x128xf32>, vector<8x128xf32> -> vector<8x256xf32>
    %c0_7 = arith.constant 0 : index
    %c0_8 = arith.constant 0 : index
    %8 = vector.load %arg2[%c0_7, %c0_8] : memref<256x512xf32, #tpu.memory_space<vmem>>, vector<256x512xf32>
    %c0_9 = arith.constant 0 : index
    %c0_10 = arith.constant 0 : index
    %9 = vector.load %arg3[%c0_9, %c0_10] : memref<1x512xf32, #tpu.memory_space<vmem>>, vector<1x512xf32>
    %cst = arith.constant dense<0.000000e+00> : vector<8x512xf32>
    %10 = tpu.matmul %7, %8, %cst {dimension_numbers = #tpu.dot_dimension_numbers<[1], [0], [0], [1], [0, 0, 1, 1], [], []>} : vector<8x256xf32>, vector<256x512xf32>, vector<8x512xf32> -> vector<8x512xf32>
    %11 = vector.broadcast %9 : vector<1x512xf32> to vector<8x512xf32>
    %12 = arith.addf %10, %11 : vector<8x512xf32>
    %13 = vector.extract_strided_slice %12 {offsets = [0, 0], sizes = [8, 128], strides = [1, 1]} : vector<8x512xf32> to vector<8x128xf32>
    %14 = arith.negf %13 : vector<8x128xf32>
    %15 = math.exp %14 : vector<8x128xf32>
    %cst_11 = arith.constant 1.000000e+00 : f32
    %16 = vector.broadcast %cst_11 : f32 to vector<8x128xf32>
    %17 = arith.addf %16, %15 : vector<8x128xf32>
    %18 = arith.divf %16, %17 : vector<8x128xf32>
    %19 = vector.extract_strided_slice %12 {offsets = [0, 128], sizes = [8, 128], strides = [1, 1]} : vector<8x512xf32> to vector<8x128xf32>
    %20 = arith.negf %19 : vector<8x128xf32>
    %21 = math.exp %20 : vector<8x128xf32>
    %cst_12 = arith.constant 1.000000e+00 : f32
    %22 = vector.broadcast %cst_12 : f32 to vector<8x128xf32>
    %23 = arith.addf %22, %21 : vector<8x128xf32>
    %24 = arith.divf %22, %23 : vector<8x128xf32>
    %25 = vector.extract_strided_slice %12 {offsets = [0, 256], sizes = [8, 128], strides = [1, 1]} : vector<8x512xf32> to vector<8x128xf32>
    %26 = math.tanh %25 : vector<8x128xf32>
    %27 = vector.extract_strided_slice %12 {offsets = [0, 384], sizes = [8, 128], strides = [1, 1]} : vector<8x512xf32> to vector<8x128xf32>
    %28 = arith.negf %27 : vector<8x128xf32>
    %29 = math.exp %28 : vector<8x128xf32>
    %cst_13 = arith.constant 1.000000e+00 : f32
    %30 = vector.broadcast %cst_13 : f32 to vector<8x128xf32>
    %31 = arith.addf %30, %29 : vector<8x128xf32>
    %32 = arith.divf %30, %31 : vector<8x128xf32>
    %33 = arith.mulf %24, %6 : vector<8x128xf32>
    %34 = arith.mulf %18, %26 : vector<8x128xf32>
    %35 = arith.addf %33, %34 : vector<8x128xf32>
    %36 = math.tanh %35 : vector<8x128xf32>
    %37 = arith.mulf %32, %36 : vector<8x128xf32>
    %c0_14 = arith.constant 0 : index
    %c0_15 = arith.constant 0 : index
    %38 = vector.load %arg4[%c0_14, %c0_15] : memref<8x128xf32, #tpu.memory_space<vmem>>, vector<8x128xf32>
    tpu.vector_store %arg4[%c0_14, %c0_15], %37 {strides = array<i32>} : memref<8x128xf32, #tpu.memory_space<vmem>>, vector<8x128xf32>,
    %c0_16 = arith.constant 0 : index
    %c0_17 = arith.constant 0 : index
    %39 = vector.load %arg5[%c0_16, %c0_17] : memref<8x128xf32, #tpu.memory_space<vmem>>, vector<8x128xf32>
    tpu.vector_store %arg5[%c0_16, %c0_17], %35 {strides = array<i32>} : memref<8x128xf32, #tpu.memory_space<vmem>>, vector<8x128xf32>,
    return
  }
  func.func @transform_0(%arg0: i32) -> (i32, i32, i32) {
    %c0_i32 = arith.constant 0 : i32
    %c0_i32_0 = arith.constant 0 : i32
    %c0_i32_1 = arith.constant 0 : i32
    return %arg0, %c0_i32, %c0_i32_0 : i32, i32, i32
  }
  func.func @transform_1(%arg0: i32) -> (i32, i32) {
    %c0_i32 = arith.constant 0 : i32
    %c0_i32_0 = arith.constant 0 : i32
    %c0_i32_1 = arith.constant 0 : i32
    return %c0_i32, %c0_i32_0 : i32, i32
  }
  func.func @transform_2(%arg0: i32) -> (i32, i32) {
    %c0_i32 = arith.constant 0 : i32
    %c0_i32_0 = arith.constant 0 : i32
    %c0_i32_1 = arith.constant 0 : i32
    return %c0_i32, %c0_i32_0 : i32, i32
  }
  func.func @transform_3(%arg0: i32) -> (i32, i32) {
    %c0_i32 = arith.constant 0 : i32
    %c0_i32_0 = arith.constant 0 : i32
    %c0_i32_1 = arith.constant 0 : i32
    return %c0_i32, %c0_i32_0 : i32, i32
  }
  func.func @transform_4(%arg0: i32) -> (i32, i32) {
    %c0_i32 = arith.constant 0 : i32
    %c0_i32_0 = arith.constant 0 : i32
    %c0_i32_1 = arith.constant 0 : i32
    return %c0_i32, %c0_i32_0 : i32, i32
  }
}

module attributes {stable_mosaic.version = 11 : i64} {
  func.func @_decoder_kernel(%arg0: i32, %arg1: memref<7xi32, #tpu.memory_space<smem>>, %arg2: memref<8x8x128xf32, #tpu.memory_space<vmem>>, %arg3: memref<8x128xf32, #tpu.memory_space<vmem>>, %arg4: memref<8x128xf32, #tpu.memory_space<vmem>>, %arg5: memref<256x512xf32, #tpu.memory_space<vmem>>, %arg6: memref<1x512xf32, #tpu.memory_space<vmem>>, %arg7: memref<128x128xf32, #tpu.memory_space<vmem>>, %arg8: memref<128x128xf32, #tpu.memory_space<vmem>>, %arg9: memref<1x128xf32, #tpu.memory_space<vmem>>, %arg10: memref<1x8x128xf32, #tpu.memory_space<vmem>>, %arg11: memref<8x128xf32, #tpu.memory_space<vmem>>, %arg12: memref<8x128xf32, #tpu.memory_space<vmem>>, %arg13: memref<8x128xf32, #tpu.memory_space<vmem>>) attributes {dimension_semantics = [#tpu.dimension_semantics<arbitrary>], iteration_bounds = array<i64: 7>, scalar_prefetch = 1 : i64, scratch_operands = 3 : i64, tpu.core_type = #tpu.core_type<tc>, window_params = [{pipeline_mode = #tpu.pipeline_mode<synchronous>, transform_indices = @transform_0, window_bounds = array<i64: 8, 8, 128>}, {pipeline_mode = #tpu.pipeline_mode<synchronous>, transform_indices = @transform_1, window_bounds = array<i64: 8, 128>}, {pipeline_mode = #tpu.pipeline_mode<synchronous>, transform_indices = @transform_2, window_bounds = array<i64: 8, 128>}, {pipeline_mode = #tpu.pipeline_mode<synchronous>, transform_indices = @transform_3, window_bounds = array<i64: 256, 512>}, {pipeline_mode = #tpu.pipeline_mode<synchronous>, transform_indices = @transform_4, window_bounds = array<i64: 1, 512>}, {pipeline_mode = #tpu.pipeline_mode<synchronous>, transform_indices = @transform_5, window_bounds = array<i64: 128, 128>}, {pipeline_mode = #tpu.pipeline_mode<synchronous>, transform_indices = @transform_6, window_bounds = array<i64: 128, 128>}, {pipeline_mode = #tpu.pipeline_mode<synchronous>, transform_indices = @transform_7, window_bounds = array<i64: 1, 128>}, {transform_indices = @transform_8, window_bounds = array<i64: 1, 8, 128>}]} {
    %c0_i32 = arith.constant 0 : i32
    %0 = arith.cmpi eq, %arg0, %c0_i32 : i32
    %1 = arith.extui %0 : i1 to i32
    %c0_i32_0 = arith.constant 0 : i32
    %2 = arith.cmpi ne, %1, %c0_i32_0 : i32
    scf.if %2 {
      %c0_36 = arith.constant 0 : index
      %c0_37 = arith.constant 0 : index
      %c0_38 = arith.constant 0 : index
      %80 = vector.load %arg2[%c0_36, %c0_37, %c0_38] : memref<8x8x128xf32, #tpu.memory_space<vmem>>, vector<1x8x128xf32>
      %81 = vector.shape_cast %80 : vector<1x8x128xf32> to vector<8x128xf32>
      %c0_39 = arith.constant 0 : index
      %c0_40 = arith.constant 0 : index
      %82 = vector.load %arg11[%c0_39, %c0_40] : memref<8x128xf32, #tpu.memory_space<vmem>>, vector<8x128xf32>
      tpu.vector_store %arg11[%c0_39, %c0_40], %81 {strides = array<i32>} : memref<8x128xf32, #tpu.memory_space<vmem>>, vector<8x128xf32>,
      %c0_41 = arith.constant 0 : index
      %c0_42 = arith.constant 0 : index
      %83 = vector.load %arg3[%c0_41, %c0_42] : memref<8x128xf32, #tpu.memory_space<vmem>>, vector<8x128xf32>
      %c0_43 = arith.constant 0 : index
      %c0_44 = arith.constant 0 : index
      %84 = vector.load %arg12[%c0_43, %c0_44] : memref<8x128xf32, #tpu.memory_space<vmem>>, vector<8x128xf32>
      tpu.vector_store %arg12[%c0_43, %c0_44], %83 {strides = array<i32>} : memref<8x128xf32, #tpu.memory_space<vmem>>, vector<8x128xf32>,
      %c0_45 = arith.constant 0 : index
      %c0_46 = arith.constant 0 : index
      %85 = vector.load %arg4[%c0_45, %c0_46] : memref<8x128xf32, #tpu.memory_space<vmem>>, vector<8x128xf32>
      %c0_47 = arith.constant 0 : index
      %c0_48 = arith.constant 0 : index
      %86 = vector.load %arg13[%c0_47, %c0_48] : memref<8x128xf32, #tpu.memory_space<vmem>>, vector<8x128xf32>
      tpu.vector_store %arg13[%c0_47, %c0_48], %85 {strides = array<i32>} : memref<8x128xf32, #tpu.memory_space<vmem>>, vector<8x128xf32>,
    } else {
    }
    %c0 = arith.constant 0 : index
    %c0_1 = arith.constant 0 : index
    %3 = vector.load %arg11[%c0, %c0_1] : memref<8x128xf32, #tpu.memory_space<vmem>>, vector<8x128xf32>
    %c0_2 = arith.constant 0 : index
    %c0_3 = arith.constant 0 : index
    %4 = vector.load %arg12[%c0_2, %c0_3] : memref<8x128xf32, #tpu.memory_space<vmem>>, vector<8x128xf32>
    %c0_4 = arith.constant 0 : index
    %c0_5 = arith.constant 0 : index
    %5 = vector.load %arg13[%c0_4, %c0_5] : memref<8x128xf32, #tpu.memory_space<vmem>>, vector<8x128xf32>
    %6 = tpu.concatenate %3, %4 in 1 : vector<8x128xf32>, vector<8x128xf32> -> vector<8x256xf32>
    %c0_6 = arith.constant 0 : index
    %c0_7 = arith.constant 0 : index
    %7 = vector.load %arg5[%c0_6, %c0_7] : memref<256x512xf32, #tpu.memory_space<vmem>>, vector<256x512xf32>
    %c0_8 = arith.constant 0 : index
    %c0_9 = arith.constant 0 : index
    %8 = vector.load %arg6[%c0_8, %c0_9] : memref<1x512xf32, #tpu.memory_space<vmem>>, vector<1x512xf32>
    %cst = arith.constant dense<0.000000e+00> : vector<8x512xf32>
    %9 = tpu.matmul %6, %7, %cst {dimension_numbers = #tpu.dot_dimension_numbers<[1], [0], [0], [1], [0, 0, 1, 1], [], []>} : vector<8x256xf32>, vector<256x512xf32>, vector<8x512xf32> -> vector<8x512xf32>
    %10 = vector.broadcast %8 : vector<1x512xf32> to vector<8x512xf32>
    %11 = arith.addf %9, %10 : vector<8x512xf32>
    %12 = vector.extract_strided_slice %11 {offsets = [0, 0], sizes = [8, 128], strides = [1, 1]} : vector<8x512xf32> to vector<8x128xf32>
    %13 = arith.negf %12 : vector<8x128xf32>
    %14 = math.exp %13 : vector<8x128xf32>
    %cst_10 = arith.constant 1.000000e+00 : f32
    %15 = vector.broadcast %cst_10 : f32 to vector<8x128xf32>
    %16 = arith.addf %15, %14 : vector<8x128xf32>
    %17 = arith.divf %15, %16 : vector<8x128xf32>
    %18 = vector.extract_strided_slice %11 {offsets = [0, 128], sizes = [8, 128], strides = [1, 1]} : vector<8x512xf32> to vector<8x128xf32>
    %19 = arith.negf %18 : vector<8x128xf32>
    %20 = math.exp %19 : vector<8x128xf32>
    %cst_11 = arith.constant 1.000000e+00 : f32
    %21 = vector.broadcast %cst_11 : f32 to vector<8x128xf32>
    %22 = arith.addf %21, %20 : vector<8x128xf32>
    %23 = arith.divf %21, %22 : vector<8x128xf32>
    %24 = vector.extract_strided_slice %11 {offsets = [0, 256], sizes = [8, 128], strides = [1, 1]} : vector<8x512xf32> to vector<8x128xf32>
    %25 = math.tanh %24 : vector<8x128xf32>
    %26 = vector.extract_strided_slice %11 {offsets = [0, 384], sizes = [8, 128], strides = [1, 1]} : vector<8x512xf32> to vector<8x128xf32>
    %27 = arith.negf %26 : vector<8x128xf32>
    %28 = math.exp %27 : vector<8x128xf32>
    %cst_12 = arith.constant 1.000000e+00 : f32
    %29 = vector.broadcast %cst_12 : f32 to vector<8x128xf32>
    %30 = arith.addf %29, %28 : vector<8x128xf32>
    %31 = arith.divf %29, %30 : vector<8x128xf32>
    %32 = arith.mulf %23, %5 : vector<8x128xf32>
    %33 = arith.mulf %17, %25 : vector<8x128xf32>
    %34 = arith.addf %32, %33 : vector<8x128xf32>
    %35 = math.tanh %34 : vector<8x128xf32>
    %36 = arith.mulf %31, %35 : vector<8x128xf32>
    %c0_13 = arith.constant 0 : index
    %c0_14 = arith.constant 0 : index
    %37 = vector.load %arg12[%c0_13, %c0_14] : memref<8x128xf32, #tpu.memory_space<vmem>>, vector<8x128xf32>
    tpu.vector_store %arg12[%c0_13, %c0_14], %36 {strides = array<i32>} : memref<8x128xf32, #tpu.memory_space<vmem>>, vector<8x128xf32>,
    %c0_15 = arith.constant 0 : index
    %c0_16 = arith.constant 0 : index
    %38 = vector.load %arg13[%c0_15, %c0_16] : memref<8x128xf32, #tpu.memory_space<vmem>>, vector<8x128xf32>
    tpu.vector_store %arg13[%c0_15, %c0_16], %34 {strides = array<i32>} : memref<8x128xf32, #tpu.memory_space<vmem>>, vector<8x128xf32>,
    %c0_17 = arith.constant 0 : index
    %c0_18 = arith.constant 0 : index
    %39 = vector.load %arg8[%c0_17, %c0_18] : memref<128x128xf32, #tpu.memory_space<vmem>>, vector<128x128xf32>
    %cst_19 = arith.constant dense<0.000000e+00> : vector<8x128xf32>
    %40 = tpu.matmul %36, %39, %cst_19 {dimension_numbers = #tpu.dot_dimension_numbers<[1], [0], [0], [1], [0, 0, 1, 1], [], []>} : vector<8x128xf32>, vector<128x128xf32>, vector<8x128xf32> -> vector<8x128xf32>
    %c0_20 = arith.constant 0 : index
    %c0_21 = arith.constant 0 : index
    %41 = vector.load %arg9[%c0_20, %c0_21] : memref<1x128xf32, #tpu.memory_space<vmem>>, vector<1x128xf32>
    %42 = vector.broadcast %41 : vector<1x128xf32> to vector<8x128xf32>
    %43 = arith.addf %40, %42 : vector<8x128xf32>
    %c0_22 = arith.constant 0 : index
    %c0_23 = arith.constant 0 : index
    %c0_24 = arith.constant 0 : index
    %44 = vector.load %arg10[%c0_22, %c0_23, %c0_24] : memref<1x8x128xf32, #tpu.memory_space<vmem>>, vector<1x8x128xf32>
    %45 = vector.shape_cast %44 : vector<1x8x128xf32> to vector<8x128xf32>
    %46 = vector.shape_cast %43 : vector<8x128xf32> to vector<1x8x128xf32>
    tpu.vector_store %arg10[%c0_22, %c0_23, %c0_24], %46 {strides = array<i32>} : memref<1x8x128xf32, #tpu.memory_space<vmem>>, vector<1x8x128xf32>,
    %47 = tpu.iota {dimensions = array<i32: 1>} : vector<8x128xi32>
    %c64_i32 = arith.constant 64 : i32
    %48 = vector.broadcast %c64_i32 : i32 to vector<8x128xi32>
    %49 = arith.cmpi slt, %47, %48 : vector<8x128xi32>
    %cst_25 = arith.constant -1.000000e+30 : f32
    %50 = vector.broadcast %cst_25 : f32 to vector<8x128xf32>
    %51 = arith.select %49, %43, %50 : vector<8x128xi1>, vector<8x128xf32>
    %cst_26 = arith.constant dense<0xFF800000> : vector<8xf32>
    %52 = vector.multi_reduction <maximumf>, %51, %cst_26 [1] : vector<8x128xf32> to vector<8xf32>
    %53 = vector.shape_cast %52 : vector<8xf32> to vector<8x1xf32>
    %54 = vector.broadcast %53 : vector<8x1xf32> to vector<8x128xf32>
    %55 = arith.cmpf oeq, %51, %54 : vector<8x128xf32>
    %c128_i32 = arith.constant 128 : i32
    %56 = vector.broadcast %c128_i32 : i32 to vector<8x128xi32>
    %57 = arith.select %55, %47, %56 : vector<8x128xi1>, vector<8x128xi32>
    %cst_27 = arith.constant dense<2147483647> : vector<8xi32>
    %58 = vector.multi_reduction <minsi>, %57, %cst_27 [1] : vector<8x128xi32> to vector<8xi32>
    %59 = vector.shape_cast %58 : vector<8xi32> to vector<8x1xi32>
    %60 = vector.broadcast %59 : vector<8x1xi32> to vector<8x128xi32>
    %61 = arith.cmpi eq, %47, %60 : vector<8x128xi32>
    %62 = arith.extui %61 : vector<8x128xi1> to vector<8x128xi32>
    %63 = arith.sitofp %62 : vector<8x128xi32> to vector<8x128xf32>
    %c0_28 = arith.constant 0 : index
    %c0_29 = arith.constant 0 : index
    %64 = vector.load %arg7[%c0_28, %c0_29] : memref<128x128xf32, #tpu.memory_space<vmem>>, vector<128x128xf32>
    %cst_30 = arith.constant dense<0.000000e+00> : vector<8x128xf32>
    %65 = tpu.matmul %63, %64, %cst_30 {dimension_numbers = #tpu.dot_dimension_numbers<[1], [0], [0], [1], [0, 0, 1, 1], [], []>} : vector<8x128xf32>, vector<128x128xf32>, vector<8x128xf32> -> vector<8x128xf32>
    %66 = arith.index_cast %arg0 : i32 to index
    %67 = memref.load %arg1[%66] : memref<7xi32, #tpu.memory_space<smem>>
    %68 = arith.sitofp %67 : i32 to f32
    %c1_i32 = arith.constant 1 : i32
    %69 = arith.addi %arg0, %c1_i32 : i32
    %70 = arith.index_cast %69 : i32 to index
    %c0_31 = arith.constant 0 : index
    %c0_32 = arith.constant 0 : index
    %71 = vector.load %arg2[%70, %c0_31, %c0_32] : memref<8x8x128xf32, #tpu.memory_space<vmem>>, vector<1x8x128xf32>
    %72 = vector.shape_cast %71 : vector<1x8x128xf32> to vector<8x128xf32>
    %73 = vector.broadcast %68 : f32 to vector<8x128xf32>
    %74 = arith.mulf %73, %72 : vector<8x128xf32>
    %cst_33 = arith.constant 1.000000e+00 : f32
    %75 = arith.subf %cst_33, %68 : f32
    %76 = vector.broadcast %75 : f32 to vector<8x128xf32>
    %77 = arith.mulf %76, %65 : vector<8x128xf32>
    %78 = arith.addf %74, %77 : vector<8x128xf32>
    %c0_34 = arith.constant 0 : index
    %c0_35 = arith.constant 0 : index
    %79 = vector.load %arg11[%c0_34, %c0_35] : memref<8x128xf32, #tpu.memory_space<vmem>>, vector<8x128xf32>
    tpu.vector_store %arg11[%c0_34, %c0_35], %78 {strides = array<i32>} : memref<8x128xf32, #tpu.memory_space<vmem>>, vector<8x128xf32>,
    return
  }
  func.func @transform_0(%arg0: i32, %arg1: memref<7xi32, #tpu.memory_space<smem>>) -> (i32, i32, i32) {
    %c0_i32 = arith.constant 0 : i32
    %c0_i32_0 = arith.constant 0 : i32
    %c0_i32_1 = arith.constant 0 : i32
    %c0_i32_2 = arith.constant 0 : i32
    return %c0_i32, %c0_i32_0, %c0_i32_1 : i32, i32, i32
  }
  func.func @transform_1(%arg0: i32, %arg1: memref<7xi32, #tpu.memory_space<smem>>) -> (i32, i32) {
    %c0_i32 = arith.constant 0 : i32
    %c0_i32_0 = arith.constant 0 : i32
    %c0_i32_1 = arith.constant 0 : i32
    return %c0_i32, %c0_i32_0 : i32, i32
  }
  func.func @transform_2(%arg0: i32, %arg1: memref<7xi32, #tpu.memory_space<smem>>) -> (i32, i32) {
    %c0_i32 = arith.constant 0 : i32
    %c0_i32_0 = arith.constant 0 : i32
    %c0_i32_1 = arith.constant 0 : i32
    return %c0_i32, %c0_i32_0 : i32, i32
  }
  func.func @transform_3(%arg0: i32, %arg1: memref<7xi32, #tpu.memory_space<smem>>) -> (i32, i32) {
    %c0_i32 = arith.constant 0 : i32
    %c0_i32_0 = arith.constant 0 : i32
    %c0_i32_1 = arith.constant 0 : i32
    return %c0_i32, %c0_i32_0 : i32, i32
  }
  func.func @transform_4(%arg0: i32, %arg1: memref<7xi32, #tpu.memory_space<smem>>) -> (i32, i32) {
    %c0_i32 = arith.constant 0 : i32
    %c0_i32_0 = arith.constant 0 : i32
    %c0_i32_1 = arith.constant 0 : i32
    return %c0_i32, %c0_i32_0 : i32, i32
  }
  func.func @transform_5(%arg0: i32, %arg1: memref<7xi32, #tpu.memory_space<smem>>) -> (i32, i32) {
    %c0_i32 = arith.constant 0 : i32
    %c0_i32_0 = arith.constant 0 : i32
    %c0_i32_1 = arith.constant 0 : i32
    return %c0_i32, %c0_i32_0 : i32, i32
  }
  func.func @transform_6(%arg0: i32, %arg1: memref<7xi32, #tpu.memory_space<smem>>) -> (i32, i32) {
    %c0_i32 = arith.constant 0 : i32
    %c0_i32_0 = arith.constant 0 : i32
    %c0_i32_1 = arith.constant 0 : i32
    return %c0_i32, %c0_i32_0 : i32, i32
  }
  func.func @transform_7(%arg0: i32, %arg1: memref<7xi32, #tpu.memory_space<smem>>) -> (i32, i32) {
    %c0_i32 = arith.constant 0 : i32
    %c0_i32_0 = arith.constant 0 : i32
    %c0_i32_1 = arith.constant 0 : i32
    return %c0_i32, %c0_i32_0 : i32, i32
  }
  func.func @transform_8(%arg0: i32, %arg1: memref<7xi32, #tpu.memory_space<smem>>) -> (i32, i32, i32) {
    %c0_i32 = arith.constant 0 : i32
    %c0_i32_0 = arith.constant 0 : i32
    %c0_i32_1 = arith.constant 0 : i32
    return %arg0, %c0_i32, %c0_i32_0 : i32, i32, i32
  }
}

</mosaic_0001>

<bundles_post_ra>
// kernel: _forward.2
= control target key start
LH: loop header
LB: loop body
LE: loop exit
PB: predicated region body
PF: predicated region fallthrough
CT: control target
= control target key end

     0   :  { %10 = vsyncpa [#allocation3], 0  ;;  %s684_s15 = smov 0   ;;  %s747_s0 = inlined_call_operand.vmem [shape: f32[6,8,128], index: 0, kind: input, shape index: {}]   ;;  %s748_s1 = inlined_call_operand.hbm [shape: f32[256,512], index: 1, kind: input, shape index: {}]   ;;  %s749_s2 = inlined_call_operand.vmem [shape: f32[1,512], index: 2, kind: input, shape index: {}]   ;;  %s750_s3 = inlined_call_operand.vmem [shape: f32[8,128], index: 3, kind: output, shape index: {0}]   ;;  %s751_s4 = inlined_call_operand.vmem [shape: f32[8,128], index: 4, kind: output, shape index: {1}]  }
   0x1 LB: > { %s690_s16 = sadd.s32 4294967295, %s653_s15   ;;  %p567_p0 = scmp.ge.s32.totalorder %s653_s15, 1  ;;  %s653_s15 = sphi %s684_s15, %s16_s15  }
   0x2   : > { %p131_p1 = scmp.lt.s32.totalorder %s653_s15, 7  ;;  %s655_s17 = smov [#allocation2]  }
   0x3   : > { %s143_s18 = sshll.u32 %s655_s17, 4  ;;  %p587_p4 = scmp.eq.s32.totalorder %s690_s16, 0  ;;  %s144_s18 = int_to_ptr.vmem [resolvable:$true] %s143_s18 }
   0x4   : > { %p695_p3 = pnand %p567_p0, %p131_p1  ;;  %s628_s20 = scalar_lea.vmem %s144_s18, 16384 }
   0x5   : > { %p629_p8 = scmp.ne.s32.totalorder %s144_s18, %s628_s20  ;;  %p636_p11 = scmp.lt.s32.totalorder %s144_s18, %s144_s18 }
   0x6   : > { %p583_p5 = pneg %p695_p3  ;;  %p637_p12 = scmp.lt.s32.totalorder %s628_s20, %s628_s20 }
   0x8   : > { %p584_p6 = pnand %p587_p4, %p583_p5  ;;  %p638_p13 = por %p637_p12, %p636_p11 }
   0xa   : > { %p619_p7 = pneg %p584_p6 }
   0xc   : > { %p631_p9 = pnand %p629_p8, %p619_p7 }
   0xe   : > { %p632_p10 = pneg %p631_p9 }
  0x10   : > { %p639_p2 = pnand %p638_p13, %p632_p10 }
  0x12   : > { %642 = shalt.err (!%p639_p2)
}
  0x13   : > { %s656_s21 = smov 512   ;;  %s657_s22 = smov 32  }
  0x14   : > { %586 = dma.hbm_to_vmem [thread:$0]  (!%p584_p6), %s748_s1, 16384, %s144_s18, [#allocation3], %s656_s21, %s656_s21, %s657_s22  }
  0x15   : > { %169 = sbr.rel (%p695_p3) target bundleno = 352 (0x160), region = 32 }
  0x1a   : > { %648 = dma.done.wait (%p587_p4), [#allocation3], 16384  }
  0x1b   : > { %650 = vsyncadd (%p587_p4), [#allocation3], 4294950912  ;;  %p189_p0 = scmp.lt.s32.totalorder %s690_s16, 5  ;;  %p753_p1 = scmp.ne.s32.totalorder %s690_s16, 0 }
  0x1d   : > { %s190_s25 = scalar_select %p189_p0, %s690_s16, 5 }
  0x1e   : > { %196 = sbr.rel (%p753_p1) target bundleno = 37 (0x25), region = 40 }
  0x1f   : > { %s572_s26 = sshll.u32 %s190_s25, 3 }
  0x20   : > { %s718_s29 = scalar_lea.vmem %s747_s0, %s572_s26 }
  0x23   : > { %v658_v0 = vmov 0.0  }
  0x24   : > { %197 = vst [vmem:[%s750_s3] sm:$0xff] %v658_v0  ;;  %198 = vst [vmem:[%s751_s4] sm:$0xff] %v658_v0 }
  0x25 PF: > { %v263_v1 = vld [vmem:[#allocation2 + $0x1e8] sm:$0xff]  ;;  %v262_v2 = vld [vmem:[#allocation2 + $0x1e0] sm:$0xff]  ;;  %v265_v9 = vld [vmem:[#allocation2 + $0x1f8] sm:$0xff] }
  0x26   : > { %v259_v3 = vld [vmem:[#allocation2 + $0x1c8] sm:$0xff]  ;;  %352 = vmatprep.subr.mxu0 %v263_v1  ;;  %v258_v4 = vld [vmem:[#allocation2 + $0x1c0] sm:$0xff]  ;;  %423 = vmatprep.subr.mxu1 %v265_v9  ;;  %v264_v11 = vld [vmem:[#allocation2 + $0x1f0] sm:$0xff] }
  0x27   : > { %353 = vmatpush1.msra.mxu0 %v262_v2  ;;  %v255_v5 = vld [vmem:[#allocation2 + $0x1a8] sm:$0xff]  ;;  %v254_v6 = vld [vmem:[#allocation2 + $0x1a0] sm:$0xff]  ;;  %424 = vmatpush1.msra.mxu1 %v264_v11  ;;  %v261_v13 = vld [vmem:[#allocation2 + $0x1d8] sm:$0xff] }
  0x28   : > { %354 = vmatprep.subr.mxu0 %v259_v3  ;;  %v251_v7 = vld [vmem:[#allocation2 + $0x188] sm:$0xff]  ;;  %v250_v8 = vld [vmem:[#allocation2 + $0x180] sm:$0xff]  ;;  %v260_v14 = vld [vmem:[#allocation2 + $0x1d0] sm:$0xff]  ;;  %425 = vmatprep.subr.mxu1 %v261_v13 }
  0x29   : > { %355 = vmatpush1.msra.mxu0 %v258_v4  ;;  %v247_v10 = vld [vmem:[#allocation2 + $0x168] sm:$0xff]  ;;  %v246_v12 = vld [vmem:[#allocation2 + $0x160] sm:$0xff]  ;;  %v257_v16 = vld [vmem:[#allocation2 + $0x1b8] sm:$0xff]  ;;  %426 = vmatpush1.msra.mxu1 %v260_v14 }
  0x2a   : > { %356 = vmatprep.subr.mxu0 %v255_v5  ;;  %v243_v15 = vld [vmem:[#allocation2 + $0x148] sm:$0xff]  ;;  %v242_v17 = vld [vmem:[#allocation2 + $0x140] sm:$0xff]  ;;  %v256_v18 = vld [vmem:[#allocation2 + $0x1b0] sm:$0xff]  ;;  %427 = vmatprep.subr.mxu1 %v257_v16 }
  0x2b   : > { %357 = vmatpush1.msra.mxu0 %v254_v6  ;;  %v253_v19 = vld [vmem:[#allocation2 + $0x198] sm:$0xff]  ;;  %v239_v20 = vld [vmem:[#allocation2 + $0x128] sm:$0xff]  ;;  %v252_v21 = vld [vmem:[#allocation2 + $0x190] sm:$0xff]  ;;  %428 = vmatpush1.msra.mxu1 %v256_v18 }
  0x2c   : > { %358 = vmatprep.subr.mxu0 %v251_v7  ;;  %v238_v22 = vld [vmem:[#allocation2 + $0x120] sm:$0xff]  ;;  %v249_v23 = vld [vmem:[#allocation2 + $0x178] sm:$0xff]  ;;  %v235_v24 = vld [vmem:[#allocation2 + $0x108] sm:$0xff]  ;;  %429 = vmatprep.subr.mxu1 %v253_v19 }
  0x2d   : > { %359 = vmatpush1.msra.mxu0 %v250_v8  ;;  %v248_v25 = vld [vmem:[#allocation2 + $0x170] sm:$0xff]  ;;  %v234_v26 = vld [vmem:[#allocation2 + $0x100] sm:$0xff]  ;;  %430 = vmatpush1.msra.mxu1 %v252_v21  ;;  %v245_v27 = vld [vmem:[#allocation2 + $0x158] sm:$0xff] }
  0x2e   : > { %360 = vmatprep.subr.mxu0 %v247_v10  ;;  %v231_v28 = vld [vmem:[#allocation2 + $0xe8] sm:$0xff]  ;;  %431 = vmatprep.subr.mxu1 %v249_v23  ;;  %v244_v29 = vld [vmem:[#allocation2 + $0x150] sm:$0xff]  ;;  %v230_v30 = vld [vmem:[#allocation2 + $0xe0] sm:$0xff] }
  0x2f   : > { %361 = vmatpush1.msra.mxu0 %v246_v12  ;;  %432 = vmatpush1.msra.mxu1 %v248_v25  ;;  %v241_v31 = vld [vmem:[#allocation2 + $0x138] sm:$0xff]  ;;  %v227_v32 = vld [vmem:[#allocation2 + $0xc8] sm:$0xff]  ;;  %v240_v33 = vld [vmem:[#allocation2 + $0x130] sm:$0xff] }
  0x30   : > { %362 = vmatprep.subr.mxu0 %v243_v15  ;;  %433 = vmatprep.subr.mxu1 %v245_v27  ;;  %v226_v34 = vld [vmem:[#allocation2 + $0xc0] sm:$0xff]  ;;  %v237_v35 = vld [vmem:[#allocation2 + $0x118] sm:$0xff]  ;;  %v223_v36 = vld [vmem:[#allocation2 + $0xa8] sm:$0xff] }
  0x31   : > { %363 = vmatpush1.msra.mxu0 %v242_v17  ;;  %434 = vmatpush1.msra.mxu1 %v244_v29  ;;  %v236_v37 = vld [vmem:[#allocation2 + $0x110] sm:$0xff]  ;;  %v222_v38 = vld [vmem:[#allocation2 + $0xa0] sm:$0xff]  ;;  %v233_v39 = vld [vmem:[#allocation2 + $0xf8] sm:$0xff] }
  0x32   : > { %364 = vmatprep.subr.mxu0 %v239_v20  ;;  %435 = vmatprep.subr.mxu1 %v241_v31  ;;  %v219_v40 = vld [vmem:[#allocation2 + $0x88] sm:$0xff]  ;;  %v232_v41 = vld [vmem:[#allocation2 + $0xf0] sm:$0xff]  ;;  %v218_v42 = vld [vmem:[#allocation2 + $0x80] sm:$0xff] }
  0x33   : > { %365 = vmatpush1.msra.mxu0 %v238_v22  ;;  %436 = vmatpush1.msra.mxu1 %v240_v33  ;;  %v229_v43 = vld [vmem:[#allocation2 + $0xd8] sm:$0xff]  ;;  %v215_v44 = vld [vmem:[#allocation2 + $0x68] sm:$0xff]  ;;  %v228_v45 = vld [vmem:[#allocation2 + $0xd0] sm:$0xff] }
  0x34   : > { %366 = vmatprep.subr.mxu0 %v235_v24  ;;  %437 = vmatprep.subr.mxu1 %v237_v35  ;;  %v214_v46 = vld [vmem:[#allocation2 + $0x60] sm:$0xff]  ;;  %v225_v47 = vld [vmem:[#allocation2 + $0xb8] sm:$0xff]  ;;  %v211_v48 = vld [vmem:[#allocation2 + $0x48] sm:$0xff] }
  0x35   : > { %367 = vmatpush1.msra.mxu0 %v234_v26  ;;  %438 = vmatpush1.msra.mxu1 %v236_v37  ;;  %v224_v49 = vld [vmem:[#allocation2 + $0xb0] sm:$0xff]  ;;  %v210_v50 = vld [vmem:[#allocation2 + $0x40] sm:$0xff]  ;;  %v221_v51 = vld [vmem:[#allocation2 + $0x98] sm:$0xff] }
  0x36   : > { %368 = vmatprep.subr.mxu0 %v231_v28  ;;  %439 = vmatprep.subr.mxu1 %v233_v39  ;;  %v207_v52 = vld [vmem:[#allocation2 + $0x28] sm:$0xff]  ;;  %v220_v53 = vld [vmem:[#allocation2 + $0x90] sm:$0xff]  ;;  %v206_v54 = vld [vmem:[#allocation2 + $0x20] sm:$0xff] }
  0x37   : > { %369 = vmatpush1.msra.mxu0 %v230_v30  ;;  %440 = vmatpush1.msra.mxu1 %v232_v41  ;;  %v217_v55 = vld [vmem:[#allocation2 + $0x78] sm:$0xff]  ;;  %v203_v56 = vld [vmem:[#allocation2 + $0x8] sm:$0xff]  ;;  %v216_v57 = vld [vmem:[#allocation2 + $0x70] sm:$0xff] }
  0x38   : > { %370 = vmatprep.subr.mxu0 %v227_v32  ;;  %441 = vmatprep.subr.mxu1 %v229_v43  ;;  %v202_v58 = vld [vmem:[#allocation2] sm:$0xff]  ;;  %v213_v59 = vld [vmem:[#allocation2 + $0x58] sm:$0xff]  ;;  %v327_v60 = vld [vmem:[#allocation2 + $0x3e8] sm:$0xff] }
  0x39   : > { %371 = vmatpush1.msra.mxu0 %v226_v34  ;;  %442 = vmatpush1.msra.mxu1 %v228_v45  ;;  %v212_v61 = vld [vmem:[#allocation2 + $0x50] sm:$0xff]  ;;  %v326_v62 = vld [vmem:[#allocation2 + $0x3e0] sm:$0xff]  ;;  %v209_v63 = vld [vmem:[#allocation2 + $0x38] sm:$0xff] }
  0x3a   : > { %372 = vmatprep.subr.mxu0 %v223_v36  ;;  %443 = vmatprep.subr.mxu1 %v225_v47  ;;  %v323_v0 = vld [vmem:[#allocation2 + $0x3c8] sm:$0xff]  ;;  %v208_v1 = vld [vmem:[#allocation2 + $0x30] sm:$0xff]  ;;  %v322_v2 = vld [vmem:[#allocation2 + $0x3c0] sm:$0xff] }
  0x3b   : > { %373 = vmatpush1.msra.mxu0 %v222_v38  ;;  %444 = vmatpush1.msra.mxu1 %v224_v49  ;;  %v205_v3 = vld [vmem:[#allocation2 + $0x18] sm:$0xff]  ;;  %v319_v4 = vld [vmem:[#allocation2 + $0x3a8] sm:$0xff]  ;;  %v204_v5 = vld [vmem:[#allocation2 + $0x10] sm:$0xff] }
  0x3c   : > { %374 = vmatprep.subr.mxu0 %v219_v40  ;;  %445 = vmatprep.subr.mxu1 %v221_v51  ;;  %v318_v6 = vld [vmem:[#allocation2 + $0x3a0] sm:$0xff]  ;;  %v329_v7 = vld [vmem:[#allocation2 + $0x3f8] sm:$0xff]  ;;  %v315_v8 = vld [vmem:[#allocation2 + $0x388] sm:$0xff] }
  0x3d   : > { %375 = vmatpush1.msra.mxu0 %v218_v42  ;;  %446 = vmatpush1.msra.mxu1 %v220_v53  ;;  %v328_v9 = vld [vmem:[#allocation2 + $0x3f0] sm:$0xff]  ;;  %v314_v10 = vld [vmem:[#allocation2 + $0x380] sm:$0xff]  ;;  %v325_v11 = vld [vmem:[#allocation2 + $0x3d8] sm:$0xff] }
  0x3e   : > { %376 = vmatprep.subr.mxu0 %v215_v44  ;;  %447 = vmatprep.subr.mxu1 %v217_v55  ;;  %v311_v12 = vld [vmem:[#allocation2 + $0x368] sm:$0xff]  ;;  %v324_v13 = vld [vmem:[#allocation2 + $0x3d0] sm:$0xff]  ;;  %v310_v14 = vld [vmem:[#allocation2 + $0x360] sm:$0xff] }
  0x3f   : > { %377 = vmatpush1.msra.mxu0 %v214_v46  ;;  %448 = vmatpush1.msra.mxu1 %v216_v57  ;;  %v321_v15 = vld [vmem:[#allocation2 + $0x3b8] sm:$0xff]  ;;  %v307_v16 = vld [vmem:[#allocation2 + $0x348] sm:$0xff]  ;;  %v320_v17 = vld [vmem:[#allocation2 + $0x3b0] sm:$0xff] }
  0x40   : > { %378 = vmatprep.subr.mxu0 %v211_v48  ;;  %449 = vmatprep.subr.mxu1 %v213_v59  ;;  %v306_v18 = vld [vmem:[#allocation2 + $0x340] sm:$0xff]  ;;  %v317_v19 = vld [vmem:[#allocation2 + $0x398] sm:$0xff]  ;;  %v303_v20 = vld [vmem:[#allocation2 + $0x328] sm:$0xff] }
  0x41   : > { %379 = vmatpush1.msra.mxu0 %v210_v50  ;;  %450 = vmatpush1.msra.mxu1 %v212_v61  ;;  %v316_v21 = vld [vmem:[#allocation2 + $0x390] sm:$0xff]  ;;  %v302_v22 = vld [vmem:[#allocation2 + $0x320] sm:$0xff]  ;;  %v313_v23 = vld [vmem:[#allocation2 + $0x378] sm:$0xff] }
  0x42   : > { %380 = vmatprep.subr.mxu0 %v207_v52  ;;  %451 = vmatprep.subr.mxu1 %v209_v63  ;;  %v299_v24 = vld [vmem:[#allocation2 + $0x308] sm:$0xff]  ;;  %v312_v25 = vld [vmem:[#allocation2 + $0x370] sm:$0xff]  ;;  %v298_v26 = vld [vmem:[#allocation2 + $0x300] sm:$0xff] }
  0x43   : > { %381 = vmatpush1.msra.mxu0 %v206_v54  ;;  %452 = vmatpush1.msra.mxu1 %v208_v1  ;;  %v309_v27 = vld [vmem:[#allocation2 + $0x358] sm:$0xff]  ;;  %v295_v28 = vld [vmem:[#allocation2 + $0x2e8] sm:$0xff]  ;;  %v308_v29 = vld [vmem:[#allocation2 + $0x350] sm:$0xff] }
  0x44   : > { %382 = vmatprep.subr.mxu0 %v203_v56  ;;  %453 = vmatprep.subr.mxu1 %v205_v3  ;;  %v294_v30 = vld [vmem:[#allocation2 + $0x2e0] sm:$0xff]  ;;  %v305_v31 = vld [vmem:[#allocation2 + $0x338] sm:$0xff]  ;;  %v291_v32 = vld [vmem:[#allocation2 + $0x2c8] sm:$0xff]  ;;  %v332_v3 = vlaneseq }
  0x45   : > { %383 = vmatpush1.msra.mxu0 %v202_v58  ;;  %454 = vmatpush1.msra.mxu1 %v204_v5  ;;  %v304_v33 = vld [vmem:[#allocation2 + $0x330] sm:$0xff]  ;;  %v290_v34 = vld [vmem:[#allocation2 + $0x2c0] sm:$0xff]  ;;  %v301_v35 = vld [vmem:[#allocation2 + $0x318] sm:$0xff] }
  0x46   : > { %384 = vmatprep.subr.mxu0 %v327_v60  ;;  %455 = vmatprep.subr.mxu1 %v329_v7  ;;  %v287_v36 = vld [vmem:[#allocation2 + $0x2a8] sm:$0xff]  ;;  %v200_v37 = vld [vmem:[%s750_s3] sm:$0xff]  ;;  %v300_v39 = vld [vmem:[#allocation2 + $0x310] sm:$0xff] }
  0x47   : > { %385 = vmatpush2.msra.mxu0 %v326_v62  ;;  %456 = vmatpush2.msra.mxu1 %v328_v9  ;;  %v286_v38 = vld [vmem:[#allocation2 + $0x2a0] sm:$0xff]  ;;  %v283_v40 = vld [vmem:[#allocation2 + $0x288] sm:$0xff]  ;;  %v297_v41 = vld [vmem:[#allocation2 + $0x2f8] sm:$0xff] }
  0x48   : > { %386 = vmatprep.subr.mxu0 %v323_v0  ;;  %457 = vmatprep.subr.mxu1 %v325_v11  ;;  %v282_v42 = vld [vmem:[#allocation2 + $0x280] sm:$0xff]  ;;  %v296_v43 = vld [vmem:[#allocation2 + $0x2f0] sm:$0xff]  ;;  %v279_v44 = vld [vmem:[#allocation2 + $0x268] sm:$0xff] }
  0x49   : > { %387 = vmatpush2.msra.mxu0 %v322_v2  ;;  %458 = vmatpush2.msra.mxu1 %v324_v13  ;;  %v293_v45 = vld [vmem:[#allocation2 + $0x2d8] sm:$0xff]  ;;  %v278_v46 = vld [vmem:[#allocation2 + $0x260] sm:$0xff]  ;;  %v292_v47 = vld [vmem:[#allocation2 + $0x2d0] sm:$0xff] }
  0x4a   : > { %388 = vmatprep.subr.mxu0 %v319_v4  ;;  %459 = vmatprep.subr.mxu1 %v321_v15  ;;  %v275_v48 = vld [vmem:[#allocation2 + $0x248] sm:$0xff]  ;;  %v289_v49 = vld [vmem:[#allocation2 + $0x2b8] sm:$0xff]  ;;  %v274_v50 = vld [vmem:[#allocation2 + $0x240] sm:$0xff]  ;;  %v333_v4 = vshrl.u32 %v332_v3, 7 }
  0x4b   : > { %389 = vmatpush2.msra.mxu0 %v318_v6  ;;  %460 = vmatpush2.msra.mxu1 %v320_v17  ;;  %v288_v51 = vld [vmem:[#allocation2 + $0x2b0] sm:$0xff]  ;;  %v271_v52 = vld [vmem:[#allocation2 + $0x228] sm:$0xff]  ;;  %v285_v53 = vld [vmem:[#allocation2 + $0x298] sm:$0xff] }
  0x4c   : > { %390 = vmatprep.subr.mxu0 %v315_v8  ;;  %461 = vmatprep.subr.mxu1 %v317_v19  ;;  %v270_v54 = vld [vmem:[#allocation2 + $0x220] sm:$0xff]  ;;  %v284_v55 = vld [vmem:[#allocation2 + $0x290] sm:$0xff]  ;;  %v267_v56 = vld [vmem:[#allocation2 + $0x208] sm:$0xff]  ;;  %v334_v5 = vsub.s32 0, %v333_v4  ;;  %v338_v7 = vsub.s32 1, %v333_v4  ;;  %v346_v15 = vsub.s32 3, %v333_v4 }
  0x4d   : > { %391 = vmatpush2.msra.mxu0 %v314_v10  ;;  %462 = vmatpush2.msra.mxu1 %v316_v21  ;;  %v281_v57 = vld [vmem:[#allocation2 + $0x278] sm:$0xff]  ;;  %v266_v58 = vld [vmem:[#allocation2 + $0x200] sm:$0xff]  ;;  %v280_v59 = vld [vmem:[#allocation2 + $0x270] sm:$0xff] }
  0x4e   : > { %392 = vmatprep.subr.mxu0 %v311_v12  ;;  %463 = vmatprep.subr.mxu1 %v313_v23  ;;  %v199_v60 = vld [vmem:[%s718_s29] sm:$0xff]  ;;  %v277_v61 = vld [vmem:[#allocation2 + $0x258] sm:$0xff]  ;;  %v276_v62 = vld [vmem:[#allocation2 + $0x250] sm:$0xff] }
  0x4f   : > { %393 = vmatpush2.msra.mxu0 %v310_v14  ;;  %464 = vmatpush2.msra.mxu1 %v312_v25  ;;  %v273_v63 = vld [vmem:[#allocation2 + $0x238] sm:$0xff]  ;;  %v272_v0 = vld [vmem:[#allocation2 + $0x230] sm:$0xff]  ;;  %v330_v6 = vld [vmem:[%s749_s2] sm:$0xf] }
  0x50   : > { %394 = vmatprep.subr.mxu0 %v307_v16  ;;  %465 = vmatprep.subr.mxu1 %v309_v27  ;;  %v269_v1 = vld [vmem:[#allocation2 + $0x218] sm:$0xff]  ;;  %v268_v2 = vld [vmem:[#allocation2 + $0x210] sm:$0xff]  ;;  %v335_v8 = vrot.slane %v330_v6, %v334_v5  ;;  %v339_v9 = vrot.slane %v330_v6, %v338_v7  ;;  %v347_v19 = vrot.slane %v330_v6, %v346_v15 }
  0x51   : > { %395 = vmatpush2.msra.mxu0 %v306_v18  ;;  %466 = vmatpush2.msra.mxu1 %v308_v29  ;;  %v342_v18 = vsub.s32 2, %v333_v4 }
  0x52   : > { %396 = vmatprep.subr.mxu0 %v303_v20  ;;  %467 = vmatprep.subr.mxu1 %v305_v31 }
  0x53   : > { %397 = vmatpush2.msra.mxu0 %v302_v22  ;;  %468 = vmatpush2.msra.mxu1 %v304_v33  ;;  %v343_v21 = vrot.slane %v330_v6, %v342_v18 }
  0x54   : > { %398 = vmatprep.subr.mxu0 %v299_v24  ;;  %469 = vmatprep.subr.mxu1 %v301_v35 }
  0x55   : > { %399 = vmatpush2.msra.mxu0 %v298_v26  ;;  %416 = vmatprep.mubr.f32.mxu0 %v200_v37 }
  0x56   : > { %400 = vmatprep.subr.mxu0 %v295_v28  ;;  %470 = vmatpush2.msra.mxu1 %v300_v39 }
  0x57   : > { %401 = vmatpush2.msra.mxu0 %v294_v30  ;;  %471 = vmatprep.subr.mxu1 %v297_v41 }
  0x58   : > { %402 = vmatprep.subr.mxu0 %v291_v32  ;;  %472 = vmatpush2.msra.mxu1 %v296_v43  ;;  %v201_v32 = vld [vmem:[%s751_s4] sm:$0xff] }
  0x59   : > { %403 = vmatpush2.msra.mxu0 %v290_v34  ;;  %473 = vmatprep.subr.mxu1 %v293_v45 }
  0x5a   : > { %404 = vmatprep.subr.mxu0 %v287_v36  ;;  %474 = vmatpush2.msra.mxu1 %v292_v47 }
  0x5b   : > { %405 = vmatpush2.msra.mxu0 %v286_v38  ;;  %475 = vmatprep.subr.mxu1 %v289_v49 }
  0x5c   : > { %406 = vmatprep.subr.mxu0 %v283_v40  ;;  %476 = vmatpush2.msra.mxu1 %v288_v51 }
  0x5d   : > { %407 = vmatpush2.msra.mxu0 %v282_v42  ;;  %477 = vmatprep.subr.mxu1 %v285_v53 }
  0x5e   : > { %408 = vmatprep.subr.mxu0 %v279_v44  ;;  %478 = vmatpush2.msra.mxu1 %v284_v55 }
  0x5f   : > { %409 = vmatpush2.msra.mxu0 %v278_v46  ;;  %479 = vmatprep.subr.mxu1 %v281_v57 }
  0x60   : > { %410 = vmatprep.subr.mxu0 %v275_v48  ;;  %480 = vmatpush2.msra.mxu1 %v280_v59 }
  0x61   : > { %411 = vmatpush2.msra.mxu0 %v274_v50  ;;  %481 = vmatprep.subr.mxu1 %v277_v61 }
  0x62   : > { %412 = vmatprep.subr.mxu0 %v271_v52  ;;  %482 = vmatpush2.msra.mxu1 %v276_v62 }
  0x63   : > { %413 = vmatpush2.msra.mxu0 %v270_v54  ;;  %487 = vmatprep.mubr.f32.mxu1 %v200_v37 }
  0x64   : > { %414 = vmatprep.subr.mxu0 %v267_v56  ;;  %483 = vmatprep.subr.mxu1 %v273_v63 }
  0x65   : > { %415 = vmatpush2.msra.mxu0 %v266_v58  ;;  %484 = vmatpush2.msra.mxu1 %v272_v0 }
  0x66   : > { %417 = vmatmul.mubr.f32.vlgmr.msra.gmra.mxu0 %v199_v60  ;;  %485 = vmatprep.subr.mxu1 %v269_v1 }
  0x67   : > { %486 = vmatpush2.msra.mxu1 %v268_v2 }
  0x68   : > { %488 = vmatmul.mubr.f32.vlgmr.msra.gmra.mxu1 %v199_v60 }
 0x126   : > { %v418_v10 = vpop.f32.mrf.mxu0 }
 0x127   : > { %v419_v11 = vadd.f32 %v418_v10, %v335_v8 }
 0x128   : > { %v420_v12 = vpop.f32.mrf.mxu0  ;;  %v489_v17 = vpop.f32.mrf.mxu1 }
 0x129   : > { %v574_v13 = vmul.f32 -1.442695, %v419_v11  ;;  %v421_v14 = vadd.f32 %v420_v12, %v339_v9  ;;  %v490_v23 = vadd.f32 %v489_v17, %v343_v21 }
 0x12a   : > { %v491_v20 = vpop.f32.mrf.mxu1 }
 0x12b   : > { %601 = vpow2.f32 %v574_v13  ;;  %v575_v16 = vmul.f32 -1.442695, %v421_v14  ;;  %v492_v22 = vadd.f32 %v491_v20, %v347_v19 }
 0x12d   : > { %603 = vpow2.f32 %v575_v16  ;;  %v576_v24 = vmul.f32 -1.442695, %v492_v22 }
 0x12e   : > { %605 = vtanh.f32 %v490_v23 }
 0x12f   : > { %607 = vpow2.f32 %v576_v24 }
 0x138   : > { %v602_v25 = vpop.eup %601 }
 0x139   : > { %v497_v26 = vadd.f32 1.0, %v602_v25 }
 0x13a   : > { %v604_v27 = vpop.eup %603 }
 0x13b   : > { %609 = vrcp.f32 %v497_v26  ;;  %v503_v28 = vadd.f32 1.0, %v604_v27  ;;  %v606_v29 = vpop.eup %605 }
 0x13c   : > { %v608_v30 = vpop.eup %607 }
 0x13d   : > { %611 = vrcp.f32 %v503_v28  ;;  %v510_v34 = vadd.f32 1.0, %v608_v30 }
 0x13f   : > { %613 = vrcp.f32 %v510_v34 }
 0x148   : > { %v610_v31 = vpop.eup %609 }
 0x149   : > { %v514_v36 = vmul.f32 %v610_v31, %v606_v29 }
 0x14a   : > { %v612_v33 = vpop.eup %611 }
 0x14b   : > { %v513_v35 = vmul.f32 %v612_v33, %v201_v32 }
 0x14c   : > { %v614_v38 = vpop.eup %613 }
 0x14d   : > { %v515_v37 = vadd.f32 %v514_v36, %v513_v35 }
 0x14f   : > { %615 = vtanh.f32 %v515_v37  ;;  %519 = vst [vmem:[%s751_s4] sm:$0xff] %v515_v37 }
 0x15c   : > { %v616_v39 = vpop.eup %615 }
 0x15d   : > { %v517_v40 = vmul.f32 %v616_v39, %v614_v38 }
 0x15f   : > { %518 = vst [vmem:[%s750_s3] sm:$0xff] %v517_v40 }
 0x160 PF: > { %s16_s15 = sadd.s32 1, %s653_s15  }
 0x161   : > { %p13_p2 = scmp.ge.s32.totalorder %s16_s15, 8  }
 0x163   :  { %15 = sbr.rel (!%p13_p2) target bundleno = 1 (0x1), region = 75 }
 0x168   :  { %537 = vsyncpa [#allocation3], 1 }
 0x169   :  { %539 = vsyncpa [#allocation3 + $0x1], 1 }

// kernel: _forward.3
= control target key start
LH: loop header
LB: loop body
LE: loop exit
PB: predicated region body
PF: predicated region fallthrough
CT: control target
= control target key end

     0   :  { %s1672_s0 = inlined_call_operand.vmem [shape: s32[7], index: 0, kind: input, shape index: {}]   ;;  %s1673_s1 = inlined_call_operand.vmem [shape: f32[8,8,128], index: 1, kind: input, shape index: {}]   ;;  %s1674_s2 = inlined_call_operand.vmem [shape: f32[8,128], index: 2, kind: input, shape index: {}]   ;;  %s1675_s3 = inlined_call_operand.vmem [shape: f32[8,128], index: 3, kind: input, shape index: {}]   ;;  %s1676_s4 = inlined_call_operand.vmem [shape: f32[256,512], index: 4, kind: input, shape index: {}]   ;;  %s1677_s5 = inlined_call_operand.vmem [shape: f32[1,512], index: 5, kind: input, shape index: {}]   ;;  %s1678_s6 = inlined_call_operand.vmem [shape: f32[128,128], index: 6, kind: input, shape index: {}]   ;;  %s1679_s7 = inlined_call_operand.vmem [shape: f32[128,128], index: 7, kind: input, shape index: {}]   ;;  %s1680_s8 = inlined_call_operand.vmem [shape: f32[1,128], index: 8, kind: input, shape index: {}]   ;;  %s1681_s9 = inlined_call_operand.vmem [shape: f32[7,8,128], index: 9, kind: output, shape index: {}]  }
   0x1   :  { %s14_s11 = sshll.u32 %s1672_s0, 4  ;;  %s15_s11 = int_to_ptr.vmem [resolvable:$true] %s14_s11 }
   0x2   :  { %s1032_s12 = scalar_lea.vmem %s15_s11, 16  ;;  %p1037_p1 = scmp.lt.s32.totalorder %s15_s11, %s15_s11 }
   0x3   :  { %p1033_p0 = scmp.ne.s32.totalorder %s15_s11, %s1032_s12  ;;  %p1038_p2 = scmp.lt.s32.totalorder %s1032_s12, %s1032_s12 }
   0x5   :  { %p1039_p3 = por %p1038_p2, %p1037_p1 }
   0x7   :  { %p1040_p4 = pnand %p1039_p3, %p1033_p0 }
   0x9   :  { %1043 = shalt.err (!%p1040_p4)  }
   0xa   :  { %s1054_s13 = smov [#allocation6]  }
   0xb   :  { %17 = dma.vmem_to_smem %s15_s11, 16, %s1054_s13, [#allocation5] }
   0xc   :  { %1048 = dma.done.wait [#allocation5], 16 }
   0xd   :  { %1049 = vsyncadd [#allocation5], 4294967280 }
   0xe   :  { %19 = sfence }
   0xf   :  { %s1111_s14 = smov 0  }
  0x10 LB: > { %s1117_s0 = sadd.s32 4294967295, %s1052_s14   ;;  %p887_p5 = scmp.ge.s32.totalorder %s1052_s14, 1  ;;  %s1052_s14 = sphi %s1111_s14, %s25_s14  }
  0x11   : > { %p259_p6 = scmp.lt.s32.totalorder %s1052_s14, 8 }
  0x13   : > { %p260_p7 = pnand %p887_p5, %p259_p6 }
  0x14   : > { %p287_p8 = scmp.lt.s32.totalorder (!%p260_p7), %s1117_s0, 6  ;;  %p889_p9 = scmp.ne.s32.totalorder (!%p260_p7), %s1117_s0, 0 }
  0x15   : > { %263 = sbr.rel (%p260_p7) target bundleno = 1171 (0x493), region = 52 }
  0x1a   : > { %s288_s15 = scalar_select %p287_p8, %s1117_s0, 6 }
  0x1b   : > { %294 = sbr.rel (%p889_p9) target bundleno = 36 (0x24), region = 56 }
  0x1c   : > { %s888_s16 = sshll.u32 %s288_s15, 3 }
  0x1d   : > { %s1126_s19 = scalar_lea.vmem %s1681_s9, %s888_s16 }
  0x20   : > { %v295_v0 = vld [vmem:[%s1673_s1] sm:$0xff] }
  0x21   : > { %v297_v1 = vld [vmem:[%s1674_s2] sm:$0xff]  ;;  %296 = vst [vmem:[#allocation2] sm:$0xff] %v295_v0 }
  0x22   : > { %v299_v2 = vld [vmem:[%s1675_s3] sm:$0xff]  ;;  %298 = vst [vmem:[#allocation3] sm:$0xff] %v297_v1 }
  0x23   : > { %300 = vst [vmem:[#allocation4] sm:$0xff] %v299_v2 }
  0x24 PF: > { %v365_v3 = vld [vmem:[%s1676_s4 + $0x1e8] sm:$0xff]  ;;  %v364_v4 = vld [vmem:[%s1676_s4 + $0x1e0] sm:$0xff]  ;;  %v367_v11 = vld [vmem:[%s1676_s4 + $0x1f8] sm:$0xff]  ;;  %vm1056_vm0 = vmmov 0   ;;  %s827_s25 = sld [smem:[#allocation6 + %s1117_s0]]  ;;  %s896_s27 = sshll.u32 %s1117_s0, 3 }
  0x25   : > { %v361_v5 = vld [vmem:[%s1676_s4 + $0x1c8] sm:$0xff]  ;;  %454 = vmatprep.subr.mxu0 %v365_v3  ;;  %v360_v6 = vld [vmem:[%s1676_s4 + $0x1c0] sm:$0xff]  ;;  %525 = vmatprep.subr.mxu1 %v367_v11  ;;  %v366_v13 = vld [vmem:[%s1676_s4 + $0x1f0] sm:$0xff]  ;;  %s864_s30 = scalar_lea.vmem %s1673_s1, %s896_s27 }
  0x26   : > { %455 = vmatpush1.msra.mxu0 %v364_v4  ;;  %v357_v7 = vld [vmem:[%s1676_s4 + $0x1a8] sm:$0xff]  ;;  %v356_v8 = vld [vmem:[%s1676_s4 + $0x1a0] sm:$0xff]  ;;  %526 = vmatpush1.msra.mxu1 %v366_v13  ;;  %v363_v15 = vld [vmem:[%s1676_s4 + $0x1d8] sm:$0xff] }
  0x27   : > { %456 = vmatprep.subr.mxu0 %v361_v5  ;;  %v353_v9 = vld [vmem:[%s1676_s4 + $0x188] sm:$0xff]  ;;  %v352_v10 = vld [vmem:[%s1676_s4 + $0x180] sm:$0xff]  ;;  %v362_v16 = vld [vmem:[%s1676_s4 + $0x1d0] sm:$0xff]  ;;  %527 = vmatprep.subr.mxu1 %v363_v15 }
  0x28   : > { %457 = vmatpush1.msra.mxu0 %v360_v6  ;;  %v349_v12 = vld [vmem:[%s1676_s4 + $0x168] sm:$0xff]  ;;  %v348_v14 = vld [vmem:[%s1676_s4 + $0x160] sm:$0xff]  ;;  %v359_v18 = vld [vmem:[%s1676_s4 + $0x1b8] sm:$0xff]  ;;  %528 = vmatpush1.msra.mxu1 %v362_v16 }
  0x29   : > { %458 = vmatprep.subr.mxu0 %v357_v7  ;;  %v345_v17 = vld [vmem:[%s1676_s4 + $0x148] sm:$0xff]  ;;  %v344_v19 = vld [vmem:[%s1676_s4 + $0x140] sm:$0xff]  ;;  %v358_v20 = vld [vmem:[%s1676_s4 + $0x1b0] sm:$0xff]  ;;  %529 = vmatprep.subr.mxu1 %v359_v18 }
  0x2a   : > { %459 = vmatpush1.msra.mxu0 %v356_v8  ;;  %v355_v21 = vld [vmem:[%s1676_s4 + $0x198] sm:$0xff]  ;;  %v341_v22 = vld [vmem:[%s1676_s4 + $0x128] sm:$0xff]  ;;  %v354_v23 = vld [vmem:[%s1676_s4 + $0x190] sm:$0xff]  ;;  %530 = vmatpush1.msra.mxu1 %v358_v20  ;;  %s828_s26 = scvt.s32.f32 %s827_s25 }
  0x2b   : > { %460 = vmatprep.subr.mxu0 %v353_v9  ;;  %v340_v24 = vld [vmem:[%s1676_s4 + $0x120] sm:$0xff]  ;;  %v351_v25 = vld [vmem:[%s1676_s4 + $0x178] sm:$0xff]  ;;  %v337_v26 = vld [vmem:[%s1676_s4 + $0x108] sm:$0xff]  ;;  %531 = vmatprep.subr.mxu1 %v355_v21 }
  0x2c   : > { %461 = vmatpush1.msra.mxu0 %v352_v10  ;;  %v350_v27 = vld [vmem:[%s1676_s4 + $0x170] sm:$0xff]  ;;  %v336_v28 = vld [vmem:[%s1676_s4 + $0x100] sm:$0xff]  ;;  %532 = vmatpush1.msra.mxu1 %v354_v23  ;;  %v347_v29 = vld [vmem:[%s1676_s4 + $0x158] sm:$0xff]  ;;  %s835_s10 = ssub.f32 1.0, %s828_s26 }
  0x2d   : > { %462 = vmatprep.subr.mxu0 %v349_v12  ;;  %v333_v30 = vld [vmem:[%s1676_s4 + $0xe8] sm:$0xff]  ;;  %533 = vmatprep.subr.mxu1 %v351_v25  ;;  %v346_v31 = vld [vmem:[%s1676_s4 + $0x150] sm:$0xff]  ;;  %v332_v32 = vld [vmem:[%s1676_s4 + $0xe0] sm:$0xff] }
  0x2e   : > { %463 = vmatpush1.msra.mxu0 %v348_v14  ;;  %534 = vmatpush1.msra.mxu1 %v350_v27  ;;  %v343_v33 = vld [vmem:[%s1676_s4 + $0x138] sm:$0xff]  ;;  %v329_v34 = vld [vmem:[%s1676_s4 + $0xc8] sm:$0xff]  ;;  %v342_v35 = vld [vmem:[%s1676_s4 + $0x130] sm:$0xff] }
  0x2f   : > { %464 = vmatprep.subr.mxu0 %v345_v17  ;;  %535 = vmatprep.subr.mxu1 %v347_v29  ;;  %v328_v36 = vld [vmem:[%s1676_s4 + $0xc0] sm:$0xff]  ;;  %v339_v37 = vld [vmem:[%s1676_s4 + $0x118] sm:$0xff]  ;;  %v325_v38 = vld [vmem:[%s1676_s4 + $0xa8] sm:$0xff] }
  0x30   : > { %465 = vmatpush1.msra.mxu0 %v344_v19  ;;  %536 = vmatpush1.msra.mxu1 %v346_v31  ;;  %v338_v39 = vld [vmem:[%s1676_s4 + $0x110] sm:$0xff]  ;;  %v324_v40 = vld [vmem:[%s1676_s4 + $0xa0] sm:$0xff]  ;;  %v335_v41 = vld [vmem:[%s1676_s4 + $0xf8] sm:$0xff] }
  0x31   : > { %466 = vmatprep.subr.mxu0 %v341_v22  ;;  %537 = vmatprep.subr.mxu1 %v343_v33  ;;  %v321_v42 = vld [vmem:[%s1676_s4 + $0x88] sm:$0xff]  ;;  %v334_v43 = vld [vmem:[%s1676_s4 + $0xf0] sm:$0xff]  ;;  %v320_v44 = vld [vmem:[%s1676_s4 + $0x80] sm:$0xff] }
  0x32   : > { %467 = vmatpush1.msra.mxu0 %v340_v24  ;;  %538 = vmatpush1.msra.mxu1 %v342_v35  ;;  %v331_v45 = vld [vmem:[%s1676_s4 + $0xd8] sm:$0xff]  ;;  %v317_v46 = vld [vmem:[%s1676_s4 + $0x68] sm:$0xff]  ;;  %v330_v47 = vld [vmem:[%s1676_s4 + $0xd0] sm:$0xff] }
  0x33   : > { %468 = vmatprep.subr.mxu0 %v337_v26  ;;  %539 = vmatprep.subr.mxu1 %v339_v37  ;;  %v316_v48 = vld [vmem:[%s1676_s4 + $0x60] sm:$0xff]  ;;  %v327_v49 = vld [vmem:[%s1676_s4 + $0xb8] sm:$0xff]  ;;  %v313_v50 = vld [vmem:[%s1676_s4 + $0x48] sm:$0xff] }
  0x34   : > { %469 = vmatpush1.msra.mxu0 %v336_v28  ;;  %540 = vmatpush1.msra.mxu1 %v338_v39  ;;  %v326_v51 = vld [vmem:[%s1676_s4 + $0xb0] sm:$0xff]  ;;  %v312_v52 = vld [vmem:[%s1676_s4 + $0x40] sm:$0xff]  ;;  %v323_v53 = vld [vmem:[%s1676_s4 + $0x98] sm:$0xff] }
  0x35   : > { %470 = vmatprep.subr.mxu0 %v333_v30  ;;  %541 = vmatprep.subr.mxu1 %v335_v41  ;;  %v309_v54 = vld [vmem:[%s1676_s4 + $0x28] sm:$0xff]  ;;  %v322_v55 = vld [vmem:[%s1676_s4 + $0x90] sm:$0xff]  ;;  %v308_v56 = vld [vmem:[%s1676_s4 + $0x20] sm:$0xff] }
  0x36   : > { %471 = vmatpush1.msra.mxu0 %v332_v32  ;;  %542 = vmatpush1.msra.mxu1 %v334_v43  ;;  %v319_v57 = vld [vmem:[%s1676_s4 + $0x78] sm:$0xff]  ;;  %v305_v58 = vld [vmem:[%s1676_s4 + $0x8] sm:$0xff]  ;;  %v318_v59 = vld [vmem:[%s1676_s4 + $0x70] sm:$0xff] }
  0x37   : > { %472 = vmatprep.subr.mxu0 %v329_v34  ;;  %543 = vmatprep.subr.mxu1 %v331_v45  ;;  %v304_v60 = vld [vmem:[%s1676_s4] sm:$0xff]  ;;  %v315_v61 = vld [vmem:[%s1676_s4 + $0x58] sm:$0xff]  ;;  %v429_v62 = vld [vmem:[%s1676_s4 + $0x3e8] sm:$0xff] }
  0x38   : > { %473 = vmatpush1.msra.mxu0 %v328_v36  ;;  %544 = vmatpush1.msra.mxu1 %v330_v47  ;;  %v314_v63 = vld [vmem:[%s1676_s4 + $0x50] sm:$0xff]  ;;  %v428_v0 = vld [vmem:[%s1676_s4 + $0x3e0] sm:$0xff]  ;;  %v311_v1 = vld [vmem:[%s1676_s4 + $0x38] sm:$0xff] }
  0x39   : > { %474 = vmatprep.subr.mxu0 %v325_v38  ;;  %545 = vmatprep.subr.mxu1 %v327_v49  ;;  %v425_v2 = vld [vmem:[%s1676_s4 + $0x3c8] sm:$0xff]  ;;  %v310_v3 = vld [vmem:[%s1676_s4 + $0x30] sm:$0xff]  ;;  %v424_v4 = vld [vmem:[%s1676_s4 + $0x3c0] sm:$0xff] }
  0x3a   : > { %475 = vmatpush1.msra.mxu0 %v324_v40  ;;  %546 = vmatpush1.msra.mxu1 %v326_v51  ;;  %v307_v5 = vld [vmem:[%s1676_s4 + $0x18] sm:$0xff]  ;;  %v421_v6 = vld [vmem:[%s1676_s4 + $0x3a8] sm:$0xff]  ;;  %v306_v7 = vld [vmem:[%s1676_s4 + $0x10] sm:$0xff] }
  0x3b   : > { %476 = vmatprep.subr.mxu0 %v321_v42  ;;  %547 = vmatprep.subr.mxu1 %v323_v53  ;;  %v420_v8 = vld [vmem:[%s1676_s4 + $0x3a0] sm:$0xff]  ;;  %v431_v9 = vld [vmem:[%s1676_s4 + $0x3f8] sm:$0xff]  ;;  %v417_v10 = vld [vmem:[%s1676_s4 + $0x388] sm:$0xff] }
  0x3c   : > { %477 = vmatpush1.msra.mxu0 %v320_v44  ;;  %548 = vmatpush1.msra.mxu1 %v322_v55  ;;  %v430_v11 = vld [vmem:[%s1676_s4 + $0x3f0] sm:$0xff]  ;;  %v416_v12 = vld [vmem:[%s1676_s4 + $0x380] sm:$0xff]  ;;  %v427_v13 = vld [vmem:[%s1676_s4 + $0x3d8] sm:$0xff] }
  0x3d   : > { %478 = vmatprep.subr.mxu0 %v317_v46  ;;  %549 = vmatprep.subr.mxu1 %v319_v57  ;;  %v413_v14 = vld [vmem:[%s1676_s4 + $0x368] sm:$0xff]  ;;  %v426_v15 = vld [vmem:[%s1676_s4 + $0x3d0] sm:$0xff]  ;;  %v412_v16 = vld [vmem:[%s1676_s4 + $0x360] sm:$0xff] }
  0x3e   : > { %479 = vmatpush1.msra.mxu0 %v316_v48  ;;  %550 = vmatpush1.msra.mxu1 %v318_v59  ;;  %v423_v17 = vld [vmem:[%s1676_s4 + $0x3b8] sm:$0xff]  ;;  %v409_v18 = vld [vmem:[%s1676_s4 + $0x348] sm:$0xff]  ;;  %v422_v19 = vld [vmem:[%s1676_s4 + $0x3b0] sm:$0xff] }
  0x3f   : > { %480 = vmatprep.subr.mxu0 %v313_v50  ;;  %551 = vmatprep.subr.mxu1 %v315_v61  ;;  %v408_v20 = vld [vmem:[%s1676_s4 + $0x340] sm:$0xff]  ;;  %v419_v21 = vld [vmem:[%s1676_s4 + $0x398] sm:$0xff]  ;;  %v405_v22 = vld [vmem:[%s1676_s4 + $0x328] sm:$0xff] }
  0x40   : > { %481 = vmatpush1.msra.mxu0 %v312_v52  ;;  %552 = vmatpush1.msra.mxu1 %v314_v63  ;;  %v418_v23 = vld [vmem:[%s1676_s4 + $0x390] sm:$0xff]  ;;  %v404_v24 = vld [vmem:[%s1676_s4 + $0x320] sm:$0xff]  ;;  %v415_v25 = vld [vmem:[%s1676_s4 + $0x378] sm:$0xff] }
  0x41   : > { %482 = vmatprep.subr.mxu0 %v309_v54  ;;  %553 = vmatprep.subr.mxu1 %v311_v1  ;;  %v401_v26 = vld [vmem:[%s1676_s4 + $0x308] sm:$0xff]  ;;  %v414_v27 = vld [vmem:[%s1676_s4 + $0x370] sm:$0xff]  ;;  %v400_v28 = vld [vmem:[%s1676_s4 + $0x300] sm:$0xff] }
  0x42   : > { %483 = vmatpush1.msra.mxu0 %v308_v56  ;;  %554 = vmatpush1.msra.mxu1 %v310_v3  ;;  %v411_v29 = vld [vmem:[%s1676_s4 + $0x358] sm:$0xff]  ;;  %v397_v30 = vld [vmem:[%s1676_s4 + $0x2e8] sm:$0xff]  ;;  %v410_v31 = vld [vmem:[%s1676_s4 + $0x350] sm:$0xff] }
  0x43   : > { %484 = vmatprep.subr.mxu0 %v305_v58  ;;  %555 = vmatprep.subr.mxu1 %v307_v5  ;;  %v396_v32 = vld [vmem:[%s1676_s4 + $0x2e0] sm:$0xff]  ;;  %v407_v33 = vld [vmem:[%s1676_s4 + $0x338] sm:$0xff]  ;;  %v393_v34 = vld [vmem:[%s1676_s4 + $0x2c8] sm:$0xff]  ;;  %v1055_v5 = vmov 0.0  }
  0x44   : > { %485 = vmatpush1.msra.mxu0 %v304_v60  ;;  %556 = vmatpush1.msra.mxu1 %v306_v7  ;;  %v406_v35 = vld [vmem:[%s1676_s4 + $0x330] sm:$0xff]  ;;  %v392_v36 = vld [vmem:[%s1676_s4 + $0x2c0] sm:$0xff]  ;;  %v403_v37 = vld [vmem:[%s1676_s4 + $0x318] sm:$0xff] }
  0x45   : > { %486 = vmatprep.subr.mxu0 %v429_v62  ;;  %557 = vmatprep.subr.mxu1 %v431_v9  ;;  %v389_v38 = vld [vmem:[%s1676_s4 + $0x2a8] sm:$0xff]  ;;  %v388_v40 = vld [vmem:[%s1676_s4 + $0x2a0] sm:$0xff]  ;;  %v402_v41 = vld [vmem:[%s1676_s4 + $0x310] sm:$0xff] }
  0x46   : > { %487 = vmatpush2.msra.mxu0 %v428_v0  ;;  %558 = vmatpush2.msra.mxu1 %v430_v11  ;;  %v302_v39 = vld [vmem:[#allocation3] sm:$0xff]  ;;  %v399_v43 = vld [vmem:[%s1676_s4 + $0x2f8] sm:$0xff]  ;;  %v384_v44 = vld [vmem:[%s1676_s4 + $0x280] sm:$0xff] }
  0x47   : > { %488 = vmatprep.subr.mxu0 %v425_v2  ;;  %559 = vmatprep.subr.mxu1 %v427_v13  ;;  %v385_v42 = vld [vmem:[%s1676_s4 + $0x288] sm:$0xff]  ;;  %v398_v45 = vld [vmem:[%s1676_s4 + $0x2f0] sm:$0xff]  ;;  %v395_v47 = vld [vmem:[%s1676_s4 + $0x2d8] sm:$0xff] }
  0x48   : > { %489 = vmatpush2.msra.mxu0 %v424_v4  ;;  %560 = vmatpush2.msra.mxu1 %v426_v15  ;;  %v381_v46 = vld [vmem:[%s1676_s4 + $0x268] sm:$0xff]  ;;  %v380_v48 = vld [vmem:[%s1676_s4 + $0x260] sm:$0xff]  ;;  %v394_v49 = vld [vmem:[%s1676_s4 + $0x2d0] sm:$0xff] }
  0x49   : > { %490 = vmatprep.subr.mxu0 %v421_v6  ;;  %561 = vmatprep.subr.mxu1 %v423_v17  ;;  %v377_v50 = vld [vmem:[%s1676_s4 + $0x248] sm:$0xff]  ;;  %v391_v51 = vld [vmem:[%s1676_s4 + $0x2b8] sm:$0xff]  ;;  %v376_v52 = vld [vmem:[%s1676_s4 + $0x240] sm:$0xff] }
  0x4a   : > { %491 = vmatpush2.msra.mxu0 %v420_v8  ;;  %562 = vmatpush2.msra.mxu1 %v422_v19  ;;  %v390_v53 = vld [vmem:[%s1676_s4 + $0x2b0] sm:$0xff]  ;;  %v373_v54 = vld [vmem:[%s1676_s4 + $0x228] sm:$0xff]  ;;  %v387_v55 = vld [vmem:[%s1676_s4 + $0x298] sm:$0xff] }
  0x4b   : > { %492 = vmatprep.subr.mxu0 %v417_v10  ;;  %563 = vmatprep.subr.mxu1 %v419_v21  ;;  %v372_v56 = vld [vmem:[%s1676_s4 + $0x220] sm:$0xff]  ;;  %v386_v57 = vld [vmem:[%s1676_s4 + $0x290] sm:$0xff]  ;;  %v369_v58 = vld [vmem:[%s1676_s4 + $0x208] sm:$0xff] }
  0x4c   : > { %493 = vmatpush2.msra.mxu0 %v416_v12  ;;  %564 = vmatpush2.msra.mxu1 %v418_v23  ;;  %v383_v59 = vld [vmem:[%s1676_s4 + $0x278] sm:$0xff]  ;;  %v368_v60 = vld [vmem:[%s1676_s4 + $0x200] sm:$0xff]  ;;  %v382_v61 = vld [vmem:[%s1676_s4 + $0x270] sm:$0xff] }
  0x4d   : > { %494 = vmatprep.subr.mxu0 %v413_v14  ;;  %565 = vmatprep.subr.mxu1 %v415_v25  ;;  %v301_v62 = vld [vmem:[#allocation2] sm:$0xff]  ;;  %v379_v63 = vld [vmem:[%s1676_s4 + $0x258] sm:$0xff]  ;;  %v378_v0 = vld [vmem:[%s1676_s4 + $0x250] sm:$0xff] }
  0x4e   : > { %495 = vmatpush2.msra.mxu0 %v412_v16  ;;  %566 = vmatpush2.msra.mxu1 %v414_v27  ;;  %v375_v1 = vld [vmem:[%s1676_s4 + $0x238] sm:$0xff]  ;;  %v374_v2 = vld [vmem:[%s1676_s4 + $0x230] sm:$0xff]  ;;  %v635_v8 = vld [vmem:[%s1679_s7 + $0x68] sm:$0xff] }
  0x4f   : > { %496 = vmatprep.subr.mxu0 %v409_v18  ;;  %567 = vmatprep.subr.mxu1 %v411_v29  ;;  %v371_v3 = vld [vmem:[%s1676_s4 + $0x218] sm:$0xff]  ;;  %v370_v4 = vld [vmem:[%s1676_s4 + $0x210] sm:$0xff]  ;;  %v634_v9 = vld [vmem:[%s1679_s7 + $0x60] sm:$0xff] }
  0x50   : > { %497 = vmatpush2.msra.mxu0 %v408_v20  ;;  %568 = vmatpush2.msra.mxu1 %v410_v31  ;;  %v637_v6 = vld [vmem:[%s1679_s7 + $0x78] sm:$0xff]  ;;  %v636_v7 = vld [vmem:[%s1679_s7 + $0x70] sm:$0xff]  ;;  %v631_v12 = vld [vmem:[%s1679_s7 + $0x48] sm:$0xff] }
  0x51   : > { %498 = vmatprep.subr.mxu0 %v405_v22  ;;  %569 = vmatprep.subr.mxu1 %v407_v33  ;;  %v633_v10 = vld [vmem:[%s1679_s7 + $0x58] sm:$0xff]  ;;  %v632_v11 = vld [vmem:[%s1679_s7 + $0x50] sm:$0xff]  ;;  %v630_v13 = vld [vmem:[%s1679_s7 + $0x40] sm:$0xff]  ;;  %v434_v22 = vlaneseq }
  0x52   : > { %499 = vmatpush2.msra.mxu0 %v404_v24  ;;  %570 = vmatpush2.msra.mxu1 %v406_v35  ;;  %v629_v14 = vld [vmem:[%s1679_s7 + $0x38] sm:$0xff]  ;;  %v628_v15 = vld [vmem:[%s1679_s7 + $0x30] sm:$0xff]  ;;  %v627_v16 = vld [vmem:[%s1679_s7 + $0x28] sm:$0xff] }
  0x53   : > { %500 = vmatprep.subr.mxu0 %v401_v26  ;;  %571 = vmatprep.subr.mxu1 %v403_v37  ;;  %v626_v17 = vld [vmem:[%s1679_s7 + $0x20] sm:$0xff]  ;;  %v625_v18 = vld [vmem:[%s1679_s7 + $0x18] sm:$0xff]  ;;  %v624_v19 = vld [vmem:[%s1679_s7 + $0x10] sm:$0xff]  ;;  %v435_v23 = vshrl.u32 %v434_v22, 7 }
  0x54   : > { %501 = vmatpush2.msra.mxu0 %v400_v28  ;;  %518 = vmatprep.mubr.f32.mxu0 %v302_v39  ;;  %v623_v20 = vld [vmem:[%s1679_s7 + $0x8] sm:$0xff]  ;;  %v622_v21 = vld [vmem:[%s1679_s7] sm:$0xff] }
  0x55   : > { %502 = vmatprep.subr.mxu0 %v397_v30  ;;  %572 = vmatpush2.msra.mxu1 %v402_v41  ;;  %v436_v24 = vsub.s32 0, %v435_v23  ;;  %v432_v25 = vld [vmem:[%s1677_s5] sm:$0xf]  ;;  %v440_v26 = vsub.s32 1, %v435_v23  ;;  %v444_v37 = vsub.s32 2, %v435_v23 }
  0x56   : > { %503 = vmatpush2.msra.mxu0 %v396_v32  ;;  %573 = vmatprep.subr.mxu1 %v399_v43 }
  0x57   : > { %504 = vmatprep.subr.mxu0 %v393_v34  ;;  %574 = vmatpush2.msra.mxu1 %v398_v45  ;;  %v437_v27 = vrot.slane %v432_v25, %v436_v24  ;;  %v441_v28 = vrot.slane %v432_v25, %v440_v26  ;;  %v448_v34 = vsub.s32 3, %v435_v23  ;;  %v743_v24 = vld [vmem:[%s1678_s6 + $0x10] sm:$0xff]  ;;  %v741_v26 = vld [vmem:[%s1678_s6] sm:$0xff] }
  0x58   : > { %505 = vmatpush2.msra.mxu0 %v392_v36  ;;  %575 = vmatprep.subr.mxu1 %v395_v47 }
  0x59   : > { %506 = vmatprep.subr.mxu0 %v389_v38  ;;  %576 = vmatpush2.msra.mxu1 %v394_v49  ;;  %v449_v38 = vrot.slane %v432_v25, %v448_v34  ;;  %v836_v34 = vstv %s835_s10 }
  0x5a   : > { %507 = vmatpush2.msra.mxu0 %v388_v40  ;;  %577 = vmatprep.subr.mxu1 %v391_v51  ;;  %v445_v40 = vrot.slane %v432_v25, %v444_v37  ;;  %v303_v51 = vld [vmem:[#allocation4] sm:$0xff]  ;;  %v742_v25 = vld [vmem:[%s1678_s6 + $0x8] sm:$0xff] }
  0x5b   : > { %508 = vmatprep.subr.mxu0 %v385_v42  ;;  %578 = vmatpush2.msra.mxu1 %v390_v53 }
  0x5c   : > { %509 = vmatpush2.msra.mxu0 %v384_v44  ;;  %579 = vmatprep.subr.mxu1 %v387_v55 }
  0x5d   : > { %510 = vmatprep.subr.mxu0 %v381_v46  ;;  %580 = vmatpush2.msra.mxu1 %v386_v57 }
  0x5e   : > { %511 = vmatpush2.msra.mxu0 %v380_v48  ;;  %581 = vmatprep.subr.mxu1 %v383_v59 }
  0x5f   : > { %512 = vmatprep.subr.mxu0 %v377_v50  ;;  %582 = vmatpush2.msra.mxu1 %v382_v61  ;;  %v893_v61 = vld [vmem:[%s1680_s8] ss:$0 sm:$0xff] }
  0x60   : > { %513 = vmatpush2.msra.mxu0 %v376_v52  ;;  %583 = vmatprep.subr.mxu1 %v379_v63 }
  0x61   : > { %514 = vmatprep.subr.mxu0 %v373_v54  ;;  %584 = vmatpush2.msra.mxu1 %v378_v0 }
  0x62   : > { %515 = vmatpush2.msra.mxu0 %v372_v56  ;;  %589 = vmatprep.mubr.f32.mxu1 %v302_v39 }
  0x63   : > { %516 = vmatprep.subr.mxu0 %v369_v58  ;;  %585 = vmatprep.subr.mxu1 %v375_v1 }
  0x64   : > { %517 = vmatpush2.msra.mxu0 %v368_v60  ;;  %586 = vmatpush2.msra.mxu1 %v374_v2  ;;  %v1592_v60 = vand.u32 127, %v434_v22 }
  0x65   : > { %519 = vmatmul.mubr.f32.vlgmr.msra.gmra.mxu0 %v301_v62  ;;  %587 = vmatprep.subr.mxu1 %v371_v3 }
  0x66   : > { %588 = vmatpush2.msra.mxu1 %v370_v4  ;;  %934 = vmatprep.subr.mxu0 %v1055_v5  ;;  %vm718_vm1 = vcmp.lt.s32.totalorder %v1592_v60, 64 }
  0x67   : > { %590 = vmatmul.mubr.f32.vlgmr.msra.gmra.mxu1 %v301_v62  ;;  %969 = vmatprep.subr.mxu1 %v1055_v5 }
  0x68   : > { %935 = vmatpush3.msra.mxu0 %v637_v6  ;;  %966 = vmatprep.mubr.msk.f32.mxu0 %vm1056_vm0, %v1055_v5 }
  0x69   : > { %936 = vmatprep.subr.mxu0 %v1055_v5  ;;  %1001 = vmatprep.mubr.msk.f32.mxu1 %vm1056_vm0, %v1055_v5 }
  0x6a   : > { %937 = vmatpush3.msra.mxu0 %v636_v7  ;;  %v756_v7 = vld [vmem:[%s1678_s6 + $0x78] sm:$0xff] }
  0x6b   : > { %938 = vmatprep.subr.mxu0 %v1055_v5  ;;  %970 = vmatpush3.msra.mxu1 %v756_v7 }
  0x6c   : > { %939 = vmatpush3.msra.mxu0 %v635_v8  ;;  %v755_v8 = vld [vmem:[%s1678_s6 + $0x70] sm:$0xff]  ;;  %971 = vmatprep.subr.mxu1 %v1055_v5 }
  0x6d   : > { %940 = vmatprep.subr.mxu0 %v1055_v5  ;;  %972 = vmatpush3.msra.mxu1 %v755_v8 }
  0x6e   : > { %941 = vmatpush3.msra.mxu0 %v634_v9  ;;  %v754_v9 = vld [vmem:[%s1678_s6 + $0x68] sm:$0xff]  ;;  %973 = vmatprep.subr.mxu1 %v1055_v5 }
  0x6f   : > { %942 = vmatprep.subr.mxu0 %v1055_v5  ;;  %974 = vmatpush3.msra.mxu1 %v754_v9 }
  0x70   : > { %943 = vmatpush3.msra.mxu0 %v633_v10  ;;  %v753_v10 = vld [vmem:[%s1678_s6 + $0x60] sm:$0xff]  ;;  %975 = vmatprep.subr.mxu1 %v1055_v5 }
  0x71   : > { %944 = vmatprep.subr.mxu0 %v1055_v5  ;;  %976 = vmatpush3.msra.mxu1 %v753_v10 }
  0x72   : > { %945 = vmatpush3.msra.mxu0 %v632_v11  ;;  %v752_v11 = vld [vmem:[%s1678_s6 + $0x58] sm:$0xff]  ;;  %977 = vmatprep.subr.mxu1 %v1055_v5 }
  0x73   : > { %946 = vmatprep.subr.mxu0 %v1055_v5  ;;  %978 = vmatpush3.msra.mxu1 %v752_v11 }
  0x74   : > { %947 = vmatpush3.msra.mxu0 %v631_v12  ;;  %v751_v12 = vld [vmem:[%s1678_s6 + $0x50] sm:$0xff]  ;;  %979 = vmatprep.subr.mxu1 %v1055_v5 }
  0x75   : > { %948 = vmatprep.subr.mxu0 %v1055_v5  ;;  %980 = vmatpush3.msra.mxu1 %v751_v12 }
  0x76   : > { %949 = vmatpush3.msra.mxu0 %v630_v13  ;;  %v750_v13 = vld [vmem:[%s1678_s6 + $0x48] sm:$0xff]  ;;  %981 = vmatprep.subr.mxu1 %v1055_v5 }
  0x77   : > { %950 = vmatprep.subr.mxu0 %v1055_v5  ;;  %982 = vmatpush3.msra.mxu1 %v750_v13 }
  0x78   : > { %951 = vmatpush3.msra.mxu0 %v629_v14  ;;  %v749_v14 = vld [vmem:[%s1678_s6 + $0x40] sm:$0xff]  ;;  %983 = vmatprep.subr.mxu1 %v1055_v5 }
  0x79   : > { %952 = vmatprep.subr.mxu0 %v1055_v5  ;;  %984 = vmatpush3.msra.mxu1 %v749_v14 }
  0x7a   : > { %953 = vmatpush3.msra.mxu0 %v628_v15  ;;  %v748_v15 = vld [vmem:[%s1678_s6 + $0x38] sm:$0xff]  ;;  %985 = vmatprep.subr.mxu1 %v1055_v5 }
  0x7b   : > { %954 = vmatprep.subr.mxu0 %v1055_v5  ;;  %986 = vmatpush3.msra.mxu1 %v748_v15 }
  0x7c   : > { %955 = vmatpush3.msra.mxu0 %v627_v16  ;;  %v747_v16 = vld [vmem:[%s1678_s6 + $0x30] sm:$0xff]  ;;  %987 = vmatprep.subr.mxu1 %v1055_v5 }
  0x7d   : > { %956 = vmatprep.subr.mxu0 %v1055_v5  ;;  %988 = vmatpush3.msra.mxu1 %v747_v16 }
  0x7e   : > { %957 = vmatpush3.msra.mxu0 %v626_v17  ;;  %v746_v17 = vld [vmem:[%s1678_s6 + $0x28] sm:$0xff]  ;;  %989 = vmatprep.subr.mxu1 %v1055_v5 }
  0x7f   : > { %958 = vmatprep.subr.mxu0 %v1055_v5  ;;  %990 = vmatpush3.msra.mxu1 %v746_v17 }
  0x80   : > { %959 = vmatpush3.msra.mxu0 %v625_v18  ;;  %v745_v18 = vld [vmem:[%s1678_s6 + $0x20] sm:$0xff]  ;;  %991 = vmatprep.subr.mxu1 %v1055_v5 }
  0x81   : > { %960 = vmatprep.subr.mxu0 %v1055_v5  ;;  %992 = vmatpush3.msra.mxu1 %v745_v18 }
  0x82   : > { %961 = vmatpush3.msra.mxu0 %v624_v19  ;;  %v744_v19 = vld [vmem:[%s1678_s6 + $0x18] sm:$0xff]  ;;  %993 = vmatprep.subr.mxu1 %v1055_v5 }
  0x83   : > { %962 = vmatprep.subr.mxu0 %v1055_v5  ;;  %994 = vmatpush3.msra.mxu1 %v744_v19 }
  0x84   : > { %963 = vmatpush3.msra.mxu0 %v623_v20  ;;  %995 = vmatprep.subr.mxu1 %v1055_v5 }
  0x85   : > { %964 = vmatprep.subr.mxu0 %v1055_v5  ;;  %996 = vmatpush3.msra.mxu1 %v743_v24 }
  0x86   : > { %965 = vmatpush3.msra.mxu0 %v622_v21  ;;  %997 = vmatprep.subr.mxu1 %v1055_v5 }
  0x87   : > { %998 = vmatpush3.msra.mxu1 %v742_v25 }
  0x88   : > { %999 = vmatprep.subr.mxu1 %v1055_v5  ;;  %v897_v5 = vld [vmem:[%s864_s30 + $0x8] sm:$0xff] }
  0x89   : > { %1000 = vmatpush3.msra.mxu1 %v741_v26 }
 0x125   : > { %v520_v29 = vpop.f32.mrf.mxu0 }
 0x126   : > { %v521_v30 = vadd.f32 %v520_v29, %v437_v27 }
 0x127   : > { %v522_v31 = vpop.f32.mrf.mxu0  ;;  %v591_v36 = vpop.f32.mrf.mxu1 }
 0x128   : > { %v890_v32 = vmul.f32 -1.442695, %v521_v30  ;;  %v523_v33 = vadd.f32 %v522_v31, %v441_v28  ;;  %v592_v42 = vadd.f32 %v591_v36, %v445_v40 }
 0x129   : > { %v593_v39 = vpop.f32.mrf.mxu1 }
 0x12a   : > { %1016 = vpow2.f32 %v890_v32  ;;  %v891_v35 = vmul.f32 -1.442695, %v523_v33  ;;  %v594_v41 = vadd.f32 %v593_v39, %v449_v38  ;;  %v1057_v32 = vmov 1.0  }
 0x12b   : > { %v833_v33 = vstv %s828_s26 }
 0x12c   : > { %1018 = vpow2.f32 %v891_v35  ;;  %v892_v43 = vmul.f32 -1.442695, %v594_v41  ;;  %v834_v35 = vmul.f32 %v897_v5, %v833_v33 }
 0x12d   : > { %1020 = vtanh.f32 %v592_v42 }
 0x12e   : > { %1022 = vpow2.f32 %v892_v43 }
 0x137   : > { %v1017_v44 = vpop.eup %1016 }
 0x138   : > { %v599_v45 = vadd.f32 1.0, %v1017_v44 }
 0x139   : > { %v1019_v46 = vpop.eup %1018 }
 0x13a   : > { %1024 = vrcp.f32 %v599_v45  ;;  %v605_v47 = vadd.f32 1.0, %v1019_v46  ;;  %v1021_v48 = vpop.eup %1020 }
 0x13b   : > { %v1023_v49 = vpop.eup %1022 }
 0x13c   : > { %1026 = vrcp.f32 %v605_v47  ;;  %v612_v53 = vadd.f32 1.0, %v1023_v49 }
 0x13e   : > { %1028 = vrcp.f32 %v612_v53 }
 0x147   : > { %v1025_v50 = vpop.eup %1024 }
 0x148   : > { %v616_v55 = vmul.f32 %v1025_v50, %v1021_v48 }
 0x149   : > { %v1027_v52 = vpop.eup %1026 }
 0x14a   : > { %v615_v54 = vmul.f32 %v1027_v52, %v303_v51 }
 0x14b   : > { %v1029_v57 = vpop.eup %1028 }
 0x14c   : > { %v617_v56 = vadd.f32 %v616_v55, %v615_v54 }
 0x14e   : > { %1030 = vtanh.f32 %v617_v56  ;;  %621 = vst [vmem:[#allocation4] sm:$0xff] %v617_v56 }
 0x15b   : > { %v1031_v58 = vpop.eup %1030 }
 0x15c   : > { %v619_v59 = vmul.f32 %v1031_v58, %v1029_v57 }
 0x15e   : > { %620 = vst [vmem:[#allocation3] sm:$0xff] %v619_v59  ;;  %967 = vmatmul.mubr.f32.vlgmr.msra.gmra.mxu0 %v619_v59 }
 0x21e   : > { %v711_v62 = vpop.f32.mrf.mxu0 }
 0x21f   : > { %v712_v63 = vadd.f32 %v893_v61, %v711_v62 }
 0x220   : > { %v968_v0 = vpop.f32.mrf.mxu0 }
 0x221   : > { %715 = vst [vmem:[%s1126_s19] sm:$0xff] %v712_v63  ;;  %v719_v1 = vsel %vm718_vm1, %v712_v63, -1e+30 }
 0x222   : > { %720 = vmax.xlane.f32.xlu0 %v719_v1 }
 0x2ab   : > { %v721_v2 = vpop.xlane.xlu0 %720 }
 0x2ac   : > { %vm722_vm2 = vcmp.eq.f32.partialorder %v719_v1, %v721_v2 }
 0x2ad   : > { %v723_v3 = vsel %vm722_vm2, %v1592_v60, 128 }
 0x2ae   : > { %v725_v4 = vshra.s32 %v723_v3, 16  ;;  %v724_v20 = vand.u32 65535, %v723_v3 }
 0x2b0   : > { %v727_v6 = vcvt.s32.f32 %v725_v4  ;;  %v726_v22 = vcvt.s32.f32 %v724_v20 }
 0x2b2   : > { %728 = vmin.xlane.f32.xlu0 %v727_v6 }
 0x33b   : > { %v729_v21 = vpop.xlane.xlu0 %728 }
 0x33c   : > { %vm730_vm3 = vcmp.eq.f32.partialorder %v727_v6, %v729_v21  ;;  %v735_v27 = vcvt.f32.s32 %v729_v21 }
 0x33d   : > { %v731_v23 = vsel %vm730_vm3, %v726_v22, inf }
 0x33e   : > { %732 = vmin.xlane.f32.xlu1 %v731_v23  ;;  %v736_v29 = vshll.u32 %v735_v27, 16 }
 0x3c7   : > { %v733_v28 = vpop.xlane.xlu1 %732 }
 0x3c8   : > { %v734_v30 = vcvt.f32.s32 %v733_v28 }
 0x3ca   : > { %v737_v31 = vadd.s32 %v736_v29, %v734_v30 }
 0x3cc   : > { %vm738_vm4 = vcmp.eq.s32.totalorder %v1592_v60, %v737_v31 }
 0x3cd   : > { %1002 = vmatmul.mubr.msk.f32.vlgmr.msra.gmra.mxu1 %vm738_vm4, %v1057_v32 }
 0x48d   : > { %v823_v36 = vpop.f32.mrf.mxu1 }
 0x48e   : > { %v837_v37 = vmul.f32 %v836_v34, %v823_v36 }
 0x48f   : > { %v1003_v38 = vpop.f32.mrf.mxu1 }
 0x490   : > { %v838_v39 = vadd.f32 %v837_v37, %v834_v35 }
 0x492   : > { %839 = vst [vmem:[#allocation2] sm:$0xff] %v838_v39 }
 0x493 PF: > { %s25_s14 = sadd.s32 1, %s1052_s14  }
 0x494   : > { %p22_p10 = scmp.ge.s32.totalorder %s25_s14, 9  }
 0x496   :  { %24 = sbr.rel (!%p22_p10) target bundleno = 16 (0x10), region = 84 }

</bundles_post_ra>
